<compile_context>
chip_gen: v7x
topology: tpu7x:2x2x1
jax: 0.10.0
libtpu: 0.0.40
codegen_flags: <defaults>
</compile_context>

<pallas_src>
import jax
import jax.numpy as jnp
from jax import lax
from jax.experimental import pallas as pl
from jax.experimental.pallas import tpu as pltpu

EXPANSION = 4
BN_EPS = 1e-5


def _bottleneck_kernel(x_ref, xtop_ref, xbot_ref,
                       w1_ref, s1_ref, b1_ref,
                       w2_ref, s2_ref, b2_ref,
                       w3_ref, s3_ref, b3_ref,
                       o_ref, pad_ref, col_ref):
    # x_ref: (1, TH, W, Cin) bf16        xtop/xbot: (1, 1, W, Cin) bf16 halo rows
    # w1: (Cin, Cmid)  w2: (9*Cmid, Cmid)  w3: (Cmid, Cout)   all bf16
    # s*/b*: (1, C) f32 folded BN scale/bias
    # pad_ref: (TH+2, W+2, Cmid) bf16     col_ref: (TH, W, 9*Cmid) bf16
    TH = x_ref.shape[1]
    W = x_ref.shape[2]
    Cin = x_ref.shape[3]
    Cmid = w1_ref.shape[1]
    Cout = w3_ref.shape[1]

    ti = pl.program_id(1)
    last = pl.num_programs(1) - 1

    # ---- conv1 (1x1) + bn1 + relu on this tile's rows ----
    x2d = x_ref[0].reshape(TH * W, Cin)                             # bf16
    t1 = jnp.dot(x2d, w1_ref[...], preferred_element_type=jnp.float32)
    t1 = jnp.maximum(t1 * s1_ref[...] + b1_ref[...], 0.0).astype(jnp.bfloat16)
    pad_ref[1:TH + 1, 1:W + 1, :] = t1.reshape(TH, W, Cmid)

    # Zero only the 1-wide left/right padding columns (interior always rewritten).
    zcol = jnp.zeros((TH + 2, 1, Cmid), jnp.bfloat16)
    pad_ref[:, 0:1, :] = zcol
    pad_ref[:, W + 1:W + 2, :] = zcol

    # ---- halo rows of t1: recomputed from the single-row x blocks ----
    def halo_t1(xrow):                                              # (W, Cin) bf16
        h = jnp.dot(xrow, w1_ref[...], preferred_element_type=jnp.float32)
        h = jnp.maximum(h * s1_ref[...] + b1_ref[...], 0.0)
        return h.astype(jnp.bfloat16).reshape(1, W, Cmid)

    zrow = jnp.zeros((1, W + 2, Cmid), jnp.bfloat16)

    @pl.when(ti > 0)
    def _():
        pad_ref[0:1, 1:W + 1, :] = halo_t1(xtop_ref[0, 0])

    @pl.when(ti == 0)
    def _():
        pad_ref[0:1, :, :] = zrow

    @pl.when(ti < last)
    def _():
        pad_ref[TH + 1:TH + 2, 1:W + 1, :] = halo_t1(xbot_ref[0, 0])

    @pl.when(ti == last)
    def _():
        pad_ref[TH + 1:TH + 2, :, :] = zrow

    # ---- conv2 (3x3) + bn2 + relu: im2col -> ONE matmul with K = 9*Cmid ----
    t = 0
    for kh in range(3):                  # 9 shifted slab copies (static slices)
        for kw in range(3):
            col_ref[:, :, t * Cmid:(t + 1) * Cmid] = pad_ref[kh:kh + TH, kw:kw + W, :]
            t += 1
    patches = col_ref[...].reshape(TH * W, 9 * Cmid)                # bf16
    t2 = jnp.dot(patches, w2_ref[...], preferred_element_type=jnp.float32)
    t2 = jnp.maximum(t2 * s2_ref[...] + b2_ref[...], 0.0).astype(jnp.bfloat16)

    # ---- conv3 (1x1) + bn3, residual add (f32) + relu ----
    t3 = jnp.dot(t2, w3_ref[...], preferred_element_type=jnp.float32)
    t3 = t3 * s3_ref[...] + b3_ref[...]
    out = jnp.maximum(t3 + x2d.astype(jnp.float32), 0.0)
    o_ref[...] = out.reshape(1, TH, W, Cout).astype(o_ref.dtype)


def bottleneck_forward_nhwc(x_nhwc, w1, s1, b1, w2f, s2, b2, w3, s3, b3,
                            *, row_tile=8):
    N, H, W, Cin = x_nhwc.shape
    Cmid = w1.shape[1]
    Cout = w3.shape[1]
    if Cin != Cout:
        raise ValueError(
            "Bottleneck with downsample=None requires inplanes == planes*expansion "
            f"(Cin == Cout) for the residual add; got Cin={Cin}, Cout={Cout}.")
    if w2f.shape != (9 * Cmid, Cmid):
        raise ValueError(f"w2f must be (9*Cmid, Cmid); got {w2f.shape}")

    TH = row_tile if (row_tile > 0 and H % row_tile == 0) else H
    n_tiles = H // TH

    # Rough per-step VMEM: double-buffered ins/outs + persistent scratch.
    # Keep well under v7x's 64 MiB/TC (v5e/v6e have 128 MiB); shrink row_tile if hit.
    est = (2 * 2 * (TH * W * Cin + 2 * W * Cin
                    + Cin * Cmid + 9 * Cmid * Cmid + Cmid * Cout)
           + 2 * 4 * (TH * W * Cout + 3 * Cmid + 3 * Cout)
           + 2 * ((TH + 2) * (W + 2) * Cmid + TH * W * 9 * Cmid))
    assert est < 48 * 1024 * 1024, (
        f"row_tile={TH} needs ~{est} B of VMEM per step; reduce row_tile (v7x has 64 MiB/TC)")

    # bf16 operands for the MXU (f32 accumulation happens in-kernel).
    xb = x_nhwc.astype(jnp.bfloat16)
    w1b = w1.astype(jnp.bfloat16)
    w2b = w2f.astype(jnp.bfloat16)
    w3b = w3.astype(jnp.bfloat16)
    s1 = s1.astype(jnp.float32); b1 = b1.astype(jnp.float32)
    s2 = s2.astype(jnp.float32); b2 = b2.astype(jnp.float32)
    s3 = s3.astype(jnp.float32); b3 = b3.astype(jnp.float32)

    out = pl.pallas_call(
        _bottleneck_kernel,
        out_shape=jax.ShapeDtypeStruct((N, H, W, Cout), jnp.float32),
        grid_spec=pltpu.PrefetchScalarGridSpec(
            num_scalar_prefetch=0,
            grid=(N, n_tiles),
            in_specs=[
                # tile rows of x (residual + conv1)
                pl.BlockSpec((1, TH, W, Cin), lambda n, t: (n, t, 0, 0)),
                # one-row halos above / below (clamped; unused rows are masked
                # by pl.when inside the kernel)
                pl.BlockSpec((1, 1, W, Cin),
                             lambda n, t: (n, jnp.maximum(t * TH - 1, 0), 0, 0)),
                pl.BlockSpec((1, 1, W, Cin),
                             lambda n, t: (n, jnp.minimum((t + 1) * TH, H - 1), 0, 0)),
                pl.BlockSpec((Cin, Cmid), lambda n, t: (0, 0)),
                pl.BlockSpec((1, Cmid), lambda n, t: (0, 0)),
                pl.BlockSpec((1, Cmid), lambda n, t: (0, 0)),
                pl.BlockSpec((9 * Cmid, Cmid), lambda n, t: (0, 0)),
                pl.BlockSpec((1, Cmid), lambda n, t: (0, 0)),
                pl.BlockSpec((1, Cmid), lambda n, t: (0, 0)),
                pl.BlockSpec((Cmid, Cout), lambda n, t: (0, 0)),
                pl.BlockSpec((1, Cout), lambda n, t: (0, 0)),
                pl.BlockSpec((1, Cout), lambda n, t: (0, 0)),
            ],
            out_specs=pl.BlockSpec((1, TH, W, Cout), lambda n, t: (n, t, 0, 0)),
            scratch_shapes=[
                pltpu.VMEM((TH + 2, W + 2, Cmid), jnp.bfloat16),     # padded t1
                pltpu.VMEM((TH, W, 9 * Cmid), jnp.bfloat16),         # im2col patches
            ],
        ),
        compiler_params=pltpu.CompilerParams(
            dimension_semantics=("parallel", "parallel"),
            vmem_limit_bytes=32 * 1024 * 1024),
    )(xb, xb, xb, w1b, s1, b1, w2b, s2, b2, w3b, s3, b3)
    return out


def bottleneck_forward(x_nchw, *params, **kwargs):
    # Thin NCHW<->NHWC adapter for the PyTorch-layout harness; prefer staying
    # NHWC end-to-end (bottleneck_forward_nhwc) to avoid these HBM transposes.
    x = jnp.transpose(x_nchw, (0, 2, 3, 1))
    out = bottleneck_forward_nhwc(x, *params, **kwargs)
    return jnp.transpose(out, (0, 3, 1, 2))


# ---------------- reference (plain JAX, NCHW, matches PyTorch eval forward) ----
def _ref_forward(x, w1_pt, bn1, w2_pt, bn2, w3_pt, bn3):
    def conv(y, w, pad):
        return lax.conv_general_dilated(
            y, w, window_strides=(1, 1), padding=pad,
            dimension_numbers=('NCHW', 'OIHW', 'NCHW'))

    def bn(y, p):
        g, b, m, v = p
        return ((y - m[None, :, None, None])
                / jnp.sqrt(v[None, :, None, None] + BN_EPS)
                * g[None, :, None, None] + b[None, :, None, None])

    out = jax.nn.relu(bn(conv(x, w1_pt, 'VALID'), bn1))
    out = jax.nn.relu(bn(conv(out, w2_pt, [(1, 1), (1, 1)]), bn2))
    out = bn(conv(out, w3_pt, 'VALID'), bn3)
    return jax.nn.relu(out + x)                    # downsample is None


def _fold_bn(gamma, beta, mean, var):
    scale = gamma / jnp.sqrt(var + BN_EPS)
    bias = beta - mean * scale
    return scale.reshape(1, -1), bias.reshape(1, -1)


if __name__ == "__main__":
    # Small shapes consistent with the module: inplanes == planes*expansion.
    N, H, W = 2, 16, 16
    planes = 4
    inplanes = planes * EXPANSION      # 16
    Cout = planes * EXPANSION          # 16

    key = jax.random.PRNGKey(0)
    ks = jax.random.split(key, 16)

    # PyTorch-layout conv weights (OIHW), bias=False.
    w1_pt = 0.1 * jax.random.normal(ks[0], (planes, inplanes, 1, 1), jnp.float32)
    w2_pt = 0.1 * jax.random.normal(ks[1], (planes, planes, 3, 3), jnp.float32)
    w3_pt = 0.1 * jax.random.normal(ks[2], (Cout, planes, 1, 1), jnp.float32)

    # BatchNorm parameters + running stats (eval-mode semantics).
    # TODO(synk): training-mode BN (batch statistics / running-stat updates) is
    #             not implemented; this reproduces the module's eval() forward.
    def bn_params(kg, kb, km, kv, c):
        gamma = 1.0 + 0.1 * jax.random.normal(kg, (c,), jnp.float32)
        beta = 0.1 * jax.random.normal(kb, (c,), jnp.float32)
        mean = 0.1 * jax.random.normal(km, (c,), jnp.float32)
        var = jnp.abs(jax.random.normal(kv, (c,), jnp.float32)) + 0.5
        return gamma, beta, mean, var

    bn1 = bn_params(ks[3], ks[4], ks[5], ks[6], planes)
    bn2 = bn_params(ks[7], ks[8], ks[9], ks[10], planes)
    bn3 = bn_params(ks[11], ks[12], ks[13], ks[14], Cout)

    # Kernel-layout parameters.
    w1 = jnp.transpose(w1_pt[:, :, 0, 0], (1, 0))                 # (Cin,  Cmid)
    w2f = jnp.transpose(w2_pt, (2, 3, 1, 0)).reshape(9 * planes, planes)  # (9*Cmid, Cmid)
    w3 = jnp.transpose(w3_pt[:, :, 0, 0], (1, 0))                 # (Cmid, Cout)
    s1, b1 = _fold_bn(*bn1)
    s2, b2 = _fold_bn(*bn2)
    s3, b3 = _fold_bn(*bn3)

    x = jax.random.normal(ks[15], (N, inplanes, H, W), jnp.float32)

    out = bottleneck_forward(x, w1, s1, b1, w2f, s2, b2, w3, s3, b3, row_tile=8)
    out = jax.block_until_ready(out)

    ref = _ref_forward(x, w1_pt, bn1, w2_pt, bn2, w3_pt, bn3)
    ref = jax.block_until_ready(ref)

    assert out.shape == (N, Cout, H, W)
    max_err = float(jnp.max(jnp.abs(out - ref)))
    # bf16 matmul operands (f32 accumulation) => slightly relaxed tolerance.
    assert jnp.allclose(out, ref, atol=3e-2, rtol=3e-2), max_err
    print("KERNEL_OK")
</pallas_src>

<mosaic_0001>
module attributes {stable_mosaic.version = 11 : i64} {
  func.func @_bottleneck_kernel(%arg0: i32, %arg1: i32, %arg2: memref<1x8x16x16xbf16, #tpu.memory_space<vmem>>, %arg3: memref<1x1x16x16xbf16, #tpu.memory_space<vmem>>, %arg4: memref<1x1x16x16xbf16, #tpu.memory_space<vmem>>, %arg5: memref<16x4xbf16, #tpu.memory_space<vmem>>, %arg6: memref<1x4xf32, #tpu.memory_space<vmem>>, %arg7: memref<1x4xf32, #tpu.memory_space<vmem>>, %arg8: memref<36x4xbf16, #tpu.memory_space<vmem>>, %arg9: memref<1x4xf32, #tpu.memory_space<vmem>>, %arg10: memref<1x4xf32, #tpu.memory_space<vmem>>, %arg11: memref<4x16xbf16, #tpu.memory_space<vmem>>, %arg12: memref<1x16xf32, #tpu.memory_space<vmem>>, %arg13: memref<1x16xf32, #tpu.memory_space<vmem>>, %arg14: memref<1x8x16x16xf32, #tpu.memory_space<vmem>>, %arg15: memref<10x18x4xbf16, #tpu.memory_space<vmem>>, %arg16: memref<8x16x36xbf16, #tpu.memory_space<vmem>>) attributes {dimension_semantics = [#tpu.dimension_semantics<parallel>, #tpu.dimension_semantics<parallel>], iteration_bounds = array<i64: 2, 2>, scalar_prefetch = 0 : i64, scratch_operands = 2 : i64, tpu.core_type = #tpu.core_type<tc>, window_params = [{transform_indices = @transform_0, window_bounds = array<i64: 1, 8, 16, 16>}, {transform_indices = @transform_1, window_bounds = array<i64: 1, 1, 16, 16>}, {transform_indices = @transform_2, window_bounds = array<i64: 1, 1, 16, 16>}, {pipeline_mode = #tpu.pipeline_mode<synchronous>, transform_indices = @transform_3, window_bounds = array<i64: 16, 4>}, {pipeline_mode = #tpu.pipeline_mode<synchronous>, transform_indices = @transform_4, window_bounds = array<i64: 1, 4>}, {pipeline_mode = #tpu.pipeline_mode<synchronous>, transform_indices = @transform_5, window_bounds = array<i64: 1, 4>}, {pipeline_mode = #tpu.pipeline_mode<synchronous>, transform_indices = @transform_6, window_bounds = array<i64: 36, 4>}, {pipeline_mode = #tpu.pipeline_mode<synchronous>, transform_indices = @transform_7, window_bounds = array<i64: 1, 4>}, {pipeline_mode = #tpu.pipeline_mode<synchronous>, transform_indices = @transform_8, window_bounds = array<i64: 1, 4>}, {pipeline_mode = #tpu.pipeline_mode<synchronous>, transform_indices = @transform_9, window_bounds = array<i64: 4, 16>}, {pipeline_mode = #tpu.pipeline_mode<synchronous>, transform_indices = @transform_10, window_bounds = array<i64: 1, 16>}, {pipeline_mode = #tpu.pipeline_mode<synchronous>, transform_indices = @transform_11, window_bounds = array<i64: 1, 16>}, {transform_indices = @transform_12, window_bounds = array<i64: 1, 8, 16, 16>}]} {
    %c0 = arith.constant 0 : index
    %c0_0 = arith.constant 0 : index
    %c0_1 = arith.constant 0 : index
    %c0_2 = arith.constant 0 : index
    %0 = vector.load %arg2[%c0, %c0_0, %c0_1, %c0_2] : memref<1x8x16x16xbf16, #tpu.memory_space<vmem>>, vector<1x8x16x16xbf16>
    %1 = vector.shape_cast %0 : vector<1x8x16x16xbf16> to vector<8x16x16xbf16>
    %2 = vector.shape_cast %1 : vector<8x16x16xbf16> to vector<128x16xbf16>
    %c0_3 = arith.constant 0 : index
    %c0_4 = arith.constant 0 : index
    %3 = vector.load %arg5[%c0_3, %c0_4] : memref<16x4xbf16, #tpu.memory_space<vmem>>, vector<16x4xbf16>
    %cst = arith.constant dense<0.000000e+00> : vector<128x4xf32>
    %4 = tpu.matmul %2, %3, %cst {dimension_numbers = #tpu.dot_dimension_numbers<[1], [0], [0], [1], [0, 0, 1, 1], [], []>} : vector<128x16xbf16>, vector<16x4xbf16>, vector<128x4xf32> -> vector<128x4xf32>
    %c0_5 = arith.constant 0 : index
    %c0_6 = arith.constant 0 : index
    %5 = vector.load %arg6[%c0_5, %c0_6] : memref<1x4xf32, #tpu.memory_space<vmem>>, vector<1x4xf32>
    %6 = vector.broadcast %5 : vector<1x4xf32> to vector<128x4xf32>
    %7 = arith.mulf %4, %6 : vector<128x4xf32>
    %c0_7 = arith.constant 0 : index
    %c0_8 = arith.constant 0 : index
    %8 = vector.load %arg7[%c0_7, %c0_8] : memref<1x4xf32, #tpu.memory_space<vmem>>, vector<1x4xf32>
    %9 = vector.broadcast %8 : vector<1x4xf32> to vector<128x4xf32>
    %10 = arith.addf %7, %9 : vector<128x4xf32>
    %cst_9 = arith.constant 0.000000e+00 : f32
    %11 = vector.broadcast %cst_9 : f32 to vector<128x4xf32>
    %12 = arith.maximumf %10, %11 : vector<128x4xf32>
    %13 = arith.truncf %12 : vector<128x4xf32> to vector<128x4xbf16>
    %14 = vector.shape_cast %13 : vector<128x4xbf16> to vector<8x16x4xbf16>
    %c1 = arith.constant 1 : index
    %c1_10 = arith.constant 1 : index
    %c0_11 = arith.constant 0 : index
    %15 = vector.load %arg15[%c1, %c1_10, %c0_11] : memref<10x18x4xbf16, #tpu.memory_space<vmem>>, vector<8x16x4xbf16>
    tpu.vector_store %arg15[%c1, %c1_10, %c0_11], %14 {strides = array<i32>} : memref<10x18x4xbf16, #tpu.memory_space<vmem>>, vector<8x16x4xbf16>,
    %cst_12 = arith.constant 0.000000e+00 : bf16
    %16 = vector.broadcast %cst_12 : bf16 to vector<10x1x4xbf16>
    %c0_13 = arith.constant 0 : index
    %c0_14 = arith.constant 0 : index
    %c0_15 = arith.constant 0 : index
    %17 = vector.load %arg15[%c0_13, %c0_14, %c0_15] : memref<10x18x4xbf16, #tpu.memory_space<vmem>>, vector<10x1x4xbf16>
    tpu.vector_store %arg15[%c0_13, %c0_14, %c0_15], %16 {strides = array<i32>} : memref<10x18x4xbf16, #tpu.memory_space<vmem>>, vector<10x1x4xbf16>,
    %c0_16 = arith.constant 0 : index
    %c17 = arith.constant 17 : index
    %c0_17 = arith.constant 0 : index
    %18 = vector.load %arg15[%c0_16, %c17, %c0_17] : memref<10x18x4xbf16, #tpu.memory_space<vmem>>, vector<10x1x4xbf16>
    tpu.vector_store %arg15[%c0_16, %c17, %c0_17], %16 {strides = array<i32>} : memref<10x18x4xbf16, #tpu.memory_space<vmem>>, vector<10x1x4xbf16>,
    %cst_18 = arith.constant 0.000000e+00 : bf16
    %19 = vector.broadcast %cst_18 : bf16 to vector<1x18x4xbf16>
    %c0_i32 = arith.constant 0 : i32
    %20 = arith.cmpi sgt, %arg1, %c0_i32 : i32
    %21 = arith.extui %20 : i1 to i32
    %c0_i32_19 = arith.constant 0 : i32
    %22 = arith.cmpi ne, %21, %c0_i32_19 : i32
    scf.if %22 {
      %c0_93 = arith.constant 0 : index
      %c0_94 = arith.constant 0 : index
      %c0_95 = arith.constant 0 : index
      %c0_96 = arith.constant 0 : index
      %77 = vector.load %arg3[%c0_93, %c0_94, %c0_95, %c0_96] : memref<1x1x16x16xbf16, #tpu.memory_space<vmem>>, vector<1x1x16x16xbf16>
      %78 = vector.shape_cast %77 : vector<1x1x16x16xbf16> to vector<16x16xbf16>
      %c0_97 = arith.constant 0 : index
      %c0_98 = arith.constant 0 : index
      %79 = vector.load %arg5[%c0_97, %c0_98] : memref<16x4xbf16, #tpu.memory_space<vmem>>, vector<16x4xbf16>
      %cst_99 = arith.constant dense<0.000000e+00> : vector<16x4xf32>
      %80 = tpu.matmul %78, %79, %cst_99 {dimension_numbers = #tpu.dot_dimension_numbers<[1], [0], [0], [1], [0, 0, 1, 1], [], []>} : vector<16x16xbf16>, vector<16x4xbf16>, vector<16x4xf32> -> vector<16x4xf32>
      %c0_100 = arith.constant 0 : index
      %c0_101 = arith.constant 0 : index
      %81 = vector.load %arg6[%c0_100, %c0_101] : memref<1x4xf32, #tpu.memory_space<vmem>>, vector<1x4xf32>
      %82 = vector.broadcast %81 : vector<1x4xf32> to vector<16x4xf32>
      %83 = arith.mulf %80, %82 : vector<16x4xf32>
      %c0_102 = arith.constant 0 : index
      %c0_103 = arith.constant 0 : index
      %84 = vector.load %arg7[%c0_102, %c0_103] : memref<1x4xf32, #tpu.memory_space<vmem>>, vector<1x4xf32>
      %85 = vector.broadcast %84 : vector<1x4xf32> to vector<16x4xf32>
      %86 = arith.addf %83, %85 : vector<16x4xf32>
      %cst_104 = arith.constant 0.000000e+00 : f32
      %87 = vector.broadcast %cst_104 : f32 to vector<16x4xf32>
      %88 = arith.maximumf %86, %87 : vector<16x4xf32>
      %89 = arith.truncf %88 : vector<16x4xf32> to vector<16x4xbf16>
      %90 = vector.shape_cast %89 : vector<16x4xbf16> to vector<1x16x4xbf16>
      %c0_105 = arith.constant 0 : index
      %c1_106 = arith.constant 1 : index
      %c0_107 = arith.constant 0 : index
      %91 = vector.load %arg15[%c0_105, %c1_106, %c0_107] : memref<10x18x4xbf16, #tpu.memory_space<vmem>>, vector<1x16x4xbf16>
      tpu.vector_store %arg15[%c0_105, %c1_106, %c0_107], %90 {strides = array<i32>} : memref<10x18x4xbf16, #tpu.memory_space<vmem>>, vector<1x16x4xbf16>,
    } else {
    }
    %c0_i32_20 = arith.constant 0 : i32
    %23 = arith.cmpi eq, %arg1, %c0_i32_20 : i32
    %24 = arith.extui %23 : i1 to i32
    %c0_i32_21 = arith.constant 0 : i32
    %25 = arith.cmpi ne, %24, %c0_i32_21 : i32
    scf.if %25 {
      %c0_93 = arith.constant 0 : index
      %c0_94 = arith.constant 0 : index
      %c0_95 = arith.constant 0 : index
      %77 = vector.load %arg15[%c0_93, %c0_94, %c0_95] : memref<10x18x4xbf16, #tpu.memory_space<vmem>>, vector<1x18x4xbf16>
      tpu.vector_store %arg15[%c0_93, %c0_94, %c0_95], %19 {strides = array<i32>} : memref<10x18x4xbf16, #tpu.memory_space<vmem>>, vector<1x18x4xbf16>,
    } else {
    }
    %c1_i32 = arith.constant 1 : i32
    %26 = arith.cmpi slt, %arg1, %c1_i32 : i32
    %27 = arith.extui %26 : i1 to i32
    %c0_i32_22 = arith.constant 0 : i32
    %28 = arith.cmpi ne, %27, %c0_i32_22 : i32
    scf.if %28 {
      %c0_93 = arith.constant 0 : index
      %c0_94 = arith.constant 0 : index
      %c0_95 = arith.constant 0 : index
      %c0_96 = arith.constant 0 : index
      %77 = vector.load %arg4[%c0_93, %c0_94, %c0_95, %c0_96] : memref<1x1x16x16xbf16, #tpu.memory_space<vmem>>, vector<1x1x16x16xbf16>
      %78 = vector.shape_cast %77 : vector<1x1x16x16xbf16> to vector<16x16xbf16>
      %c0_97 = arith.constant 0 : index
      %c0_98 = arith.constant 0 : index
      %79 = vector.load %arg5[%c0_97, %c0_98] : memref<16x4xbf16, #tpu.memory_space<vmem>>, vector<16x4xbf16>
      %cst_99 = arith.constant dense<0.000000e+00> : vector<16x4xf32>
      %80 = tpu.matmul %78, %79, %cst_99 {dimension_numbers = #tpu.dot_dimension_numbers<[1], [0], [0], [1], [0, 0, 1, 1], [], []>} : vector<16x16xbf16>, vector<16x4xbf16>, vector<16x4xf32> -> vector<16x4xf32>
      %c0_100 = arith.constant 0 : index
      %c0_101 = arith.constant 0 : index
      %81 = vector.load %arg6[%c0_100, %c0_101] : memref<1x4xf32, #tpu.memory_space<vmem>>, vector<1x4xf32>
      %82 = vector.broadcast %81 : vector<1x4xf32> to vector<16x4xf32>
      %83 = arith.mulf %80, %82 : vector<16x4xf32>
      %c0_102 = arith.constant 0 : index
      %c0_103 = arith.constant 0 : index
      %84 = vector.load %arg7[%c0_102, %c0_103] : memref<1x4xf32, #tpu.memory_space<vmem>>, vector<1x4xf32>
      %85 = vector.broadcast %84 : vector<1x4xf32> to vector<16x4xf32>
      %86 = arith.addf %83, %85 : vector<16x4xf32>
      %cst_104 = arith.constant 0.000000e+00 : f32
      %87 = vector.broadcast %cst_104 : f32 to vector<16x4xf32>
      %88 = arith.maximumf %86, %87 : vector<16x4xf32>
      %89 = arith.truncf %88 : vector<16x4xf32> to vector<16x4xbf16>
      %90 = vector.shape_cast %89 : vector<16x4xbf16> to vector<1x16x4xbf16>
      %c9 = arith.constant 9 : index
      %c1_105 = arith.constant 1 : index
      %c0_106 = arith.constant 0 : index
      %91 = vector.load %arg15[%c9, %c1_105, %c0_106] : memref<10x18x4xbf16, #tpu.memory_space<vmem>>, vector<1x16x4xbf16>
      tpu.vector_store %arg15[%c9, %c1_105, %c0_106], %90 {strides = array<i32>} : memref<10x18x4xbf16, #tpu.memory_space<vmem>>, vector<1x16x4xbf16>,
    } else {
    }
    %c1_i32_23 = arith.constant 1 : i32
    %29 = arith.cmpi eq, %arg1, %c1_i32_23 : i32
    %30 = arith.extui %29 : i1 to i32
    %c0_i32_24 = arith.constant 0 : i32
    %31 = arith.cmpi ne, %30, %c0_i32_24 : i32
    scf.if %31 {
      %c9 = arith.constant 9 : index
      %c0_93 = arith.constant 0 : index
      %c0_94 = arith.constant 0 : index
      %77 = vector.load %arg15[%c9, %c0_93, %c0_94] : memref<10x18x4xbf16, #tpu.memory_space<vmem>>, vector<1x18x4xbf16>
      tpu.vector_store %arg15[%c9, %c0_93, %c0_94], %19 {strides = array<i32>} : memref<10x18x4xbf16, #tpu.memory_space<vmem>>, vector<1x18x4xbf16>,
    } else {
    }
    %c0_25 = arith.constant 0 : index
    %c0_26 = arith.constant 0 : index
    %c0_27 = arith.constant 0 : index
    %32 = vector.load %arg15[%c0_25, %c0_26, %c0_27] : memref<10x18x4xbf16, #tpu.memory_space<vmem>>, vector<8x16x4xbf16>
    %c0_28 = arith.constant 0 : index
    %c0_29 = arith.constant 0 : index
    %c0_30 = arith.constant 0 : index
    %33 = vector.load %arg16[%c0_28, %c0_29, %c0_30] : memref<8x16x36xbf16, #tpu.memory_space<vmem>>, vector<8x16x4xbf16>
    tpu.vector_store %arg16[%c0_28, %c0_29, %c0_30], %32 {strides = array<i32>} : memref<8x16x36xbf16, #tpu.memory_space<vmem>>, vector<8x16x4xbf16>,
    %c0_31 = arith.constant 0 : index
    %c1_32 = arith.constant 1 : index
    %c0_33 = arith.constant 0 : index
    %34 = vector.load %arg15[%c0_31, %c1_32, %c0_33] : memref<10x18x4xbf16, #tpu.memory_space<vmem>>, vector<8x16x4xbf16>
    %c0_34 = arith.constant 0 : index
    %c0_35 = arith.constant 0 : index
    %c4 = arith.constant 4 : index
    %35 = vector.load %arg16[%c0_34, %c0_35, %c4] : memref<8x16x36xbf16, #tpu.memory_space<vmem>>, vector<8x16x4xbf16>
    tpu.vector_store %arg16[%c0_34, %c0_35, %c4], %34 {strides = array<i32>} : memref<8x16x36xbf16, #tpu.memory_space<vmem>>, vector<8x16x4xbf16>,
    %c0_36 = arith.constant 0 : index
    %c2 = arith.constant 2 : index
    %c0_37 = arith.constant 0 : index
    %36 = vector.load %arg15[%c0_36, %c2, %c0_37] : memref<10x18x4xbf16, #tpu.memory_space<vmem>>, vector<8x16x4xbf16>
    %c0_38 = arith.constant 0 : index
    %c0_39 = arith.constant 0 : index
    %c8 = arith.constant 8 : index
    %37 = vector.load %arg16[%c0_38, %c0_39, %c8] : memref<8x16x36xbf16, #tpu.memory_space<vmem>>, vector<8x16x4xbf16>
    tpu.vector_store %arg16[%c0_38, %c0_39, %c8], %36 {strides = array<i32>} : memref<8x16x36xbf16, #tpu.memory_space<vmem>>, vector<8x16x4xbf16>,
    %c1_40 = arith.constant 1 : index
    %c0_41 = arith.constant 0 : index
    %c0_42 = arith.constant 0 : index
    %38 = vector.load %arg15[%c1_40, %c0_41, %c0_42] : memref<10x18x4xbf16, #tpu.memory_space<vmem>>, vector<8x16x4xbf16>
    %c0_43 = arith.constant 0 : index
    %c0_44 = arith.constant 0 : index
    %c12 = arith.constant 12 : index
    %39 = vector.load %arg16[%c0_43, %c0_44, %c12] : memref<8x16x36xbf16, #tpu.memory_space<vmem>>, vector<8x16x4xbf16>
    tpu.vector_store %arg16[%c0_43, %c0_44, %c12], %38 {strides = array<i32>} : memref<8x16x36xbf16, #tpu.memory_space<vmem>>, vector<8x16x4xbf16>,
    %c1_45 = arith.constant 1 : index
    %c1_46 = arith.constant 1 : index
    %c0_47 = arith.constant 0 : index
    %40 = vector.load %arg15[%c1_45, %c1_46, %c0_47] : memref<10x18x4xbf16, #tpu.memory_space<vmem>>, vector<8x16x4xbf16>
    %c0_48 = arith.constant 0 : index
    %c0_49 = arith.constant 0 : index
    %c16 = arith.constant 16 : index
    %41 = vector.load %arg16[%c0_48, %c0_49, %c16] : memref<8x16x36xbf16, #tpu.memory_space<vmem>>, vector<8x16x4xbf16>
    tpu.vector_store %arg16[%c0_48, %c0_49, %c16], %40 {strides = array<i32>} : memref<8x16x36xbf16, #tpu.memory_space<vmem>>, vector<8x16x4xbf16>,
    %c1_50 = arith.constant 1 : index
    %c2_51 = arith.constant 2 : index
    %c0_52 = arith.constant 0 : index
    %42 = vector.load %arg15[%c1_50, %c2_51, %c0_52] : memref<10x18x4xbf16, #tpu.memory_space<vmem>>, vector<8x16x4xbf16>
    %c0_53 = arith.constant 0 : index
    %c0_54 = arith.constant 0 : index
    %c20 = arith.constant 20 : index
    %43 = vector.load %arg16[%c0_53, %c0_54, %c20] : memref<8x16x36xbf16, #tpu.memory_space<vmem>>, vector<8x16x4xbf16>
    tpu.vector_store %arg16[%c0_53, %c0_54, %c20], %42 {strides = array<i32>} : memref<8x16x36xbf16, #tpu.memory_space<vmem>>, vector<8x16x4xbf16>,
    %c2_55 = arith.constant 2 : index
    %c0_56 = arith.constant 0 : index
    %c0_57 = arith.constant 0 : index
    %44 = vector.load %arg15[%c2_55, %c0_56, %c0_57] : memref<10x18x4xbf16, #tpu.memory_space<vmem>>, vector<8x16x4xbf16>
    %c0_58 = arith.constant 0 : index
    %c0_59 = arith.constant 0 : index
    %c24 = arith.constant 24 : index
    %45 = vector.load %arg16[%c0_58, %c0_59, %c24] : memref<8x16x36xbf16, #tpu.memory_space<vmem>>, vector<8x16x4xbf16>
    tpu.vector_store %arg16[%c0_58, %c0_59, %c24], %44 {strides = array<i32>} : memref<8x16x36xbf16, #tpu.memory_space<vmem>>, vector<8x16x4xbf16>,
    %c2_60 = arith.constant 2 : index
    %c1_61 = arith.constant 1 : index
    %c0_62 = arith.constant 0 : index
    %46 = vector.load %arg15[%c2_60, %c1_61, %c0_62] : memref<10x18x4xbf16, #tpu.memory_space<vmem>>, vector<8x16x4xbf16>
    %c0_63 = arith.constant 0 : index
    %c0_64 = arith.constant 0 : index
    %c28 = arith.constant 28 : index
    %47 = vector.load %arg16[%c0_63, %c0_64, %c28] : memref<8x16x36xbf16, #tpu.memory_space<vmem>>, vector<8x16x4xbf16>
    tpu.vector_store %arg16[%c0_63, %c0_64, %c28], %46 {strides = array<i32>} : memref<8x16x36xbf16, #tpu.memory_space<vmem>>, vector<8x16x4xbf16>,
    %c2_65 = arith.constant 2 : index
    %c2_66 = arith.constant 2 : index
    %c0_67 = arith.constant 0 : index
    %48 = vector.load %arg15[%c2_65, %c2_66, %c0_67] : memref<10x18x4xbf16, #tpu.memory_space<vmem>>, vector<8x16x4xbf16>
    %c0_68 = arith.constant 0 : index
    %c0_69 = arith.constant 0 : index
    %c32 = arith.constant 32 : index
    %49 = vector.load %arg16[%c0_68, %c0_69, %c32] : memref<8x16x36xbf16, #tpu.memory_space<vmem>>, vector<8x16x4xbf16>
    tpu.vector_store %arg16[%c0_68, %c0_69, %c32], %48 {strides = array<i32>} : memref<8x16x36xbf16, #tpu.memory_space<vmem>>, vector<8x16x4xbf16>,
    %c0_70 = arith.constant 0 : index
    %c0_71 = arith.constant 0 : index
    %c0_72 = arith.constant 0 : index
    %50 = vector.load %arg16[%c0_70, %c0_71, %c0_72] : memref<8x16x36xbf16, #tpu.memory_space<vmem>>, vector<8x16x36xbf16>
    %51 = vector.shape_cast %50 : vector<8x16x36xbf16> to vector<128x36xbf16>
    %c0_73 = arith.constant 0 : index
    %c0_74 = arith.constant 0 : index
    %52 = vector.load %arg8[%c0_73, %c0_74] : memref<36x4xbf16, #tpu.memory_space<vmem>>, vector<36x4xbf16>
    %cst_75 = arith.constant dense<0.000000e+00> : vector<128x4xf32>
    %53 = tpu.matmul %51, %52, %cst_75 {dimension_numbers = #tpu.dot_dimension_numbers<[1], [0], [0], [1], [0, 0, 1, 1], [], []>} : vector<128x36xbf16>, vector<36x4xbf16>, vector<128x4xf32> -> vector<128x4xf32>
    %c0_76 = arith.constant 0 : index
    %c0_77 = arith.constant 0 : index
    %54 = vector.load %arg9[%c0_76, %c0_77] : memref<1x4xf32, #tpu.memory_space<vmem>>, vector<1x4xf32>
    %55 = vector.broadcast %54 : vector<1x4xf32> to vector<128x4xf32>
    %56 = arith.mulf %53, %55 : vector<128x4xf32>
    %c0_78 = arith.constant 0 : index
    %c0_79 = arith.constant 0 : index
    %57 = vector.load %arg10[%c0_78, %c0_79] : memref<1x4xf32, #tpu.memory_space<vmem>>, vector<1x4xf32>
    %58 = vector.broadcast %57 : vector<1x4xf32> to vector<128x4xf32>
    %59 = arith.addf %56, %58 : vector<128x4xf32>
    %cst_80 = arith.constant 0.000000e+00 : f32
    %60 = vector.broadcast %cst_80 : f32 to vector<128x4xf32>
    %61 = arith.maximumf %59, %60 : vector<128x4xf32>
    %62 = arith.truncf %61 : vector<128x4xf32> to vector<128x4xbf16>
    %c0_81 = arith.constant 0 : index
    %c0_82 = arith.constant 0 : index
    %63 = vector.load %arg11[%c0_81, %c0_82] : memref<4x16xbf16, #tpu.memory_space<vmem>>, vector<4x16xbf16>
    %cst_83 = arith.constant dense<0.000000e+00> : vector<128x16xf32>
    %64 = tpu.matmul %62, %63, %cst_83 {dimension_numbers = #tpu.dot_dimension_numbers<[1], [0], [0], [1], [0, 0, 1, 1], [], []>} : vector<128x4xbf16>, vector<4x16xbf16>, vector<128x16xf32> -> vector<128x16xf32>
    %c0_84 = arith.constant 0 : index
    %c0_85 = arith.constant 0 : index
    %65 = vector.load %arg12[%c0_84, %c0_85] : memref<1x16xf32, #tpu.memory_space<vmem>>, vector<1x16xf32>
    %66 = vector.broadcast %65 : vector<1x16xf32> to vector<128x16xf32>
    %67 = arith.mulf %64, %66 : vector<128x16xf32>
    %c0_86 = arith.constant 0 : index
    %c0_87 = arith.constant 0 : index
    %68 = vector.load %arg13[%c0_86, %c0_87] : memref<1x16xf32, #tpu.memory_space<vmem>>, vector<1x16xf32>
    %69 = vector.broadcast %68 : vector<1x16xf32> to vector<128x16xf32>
    %70 = arith.addf %67, %69 : vector<128x16xf32>
    %71 = arith.extf %2 : vector<128x16xbf16> to vector<128x16xf32>
    %72 = arith.addf %70, %71 : vector<128x16xf32>
    %cst_88 = arith.constant 0.000000e+00 : f32
    %73 = vector.broadcast %cst_88 : f32 to vector<128x16xf32>
    %74 = arith.maximumf %72, %73 : vector<128x16xf32>
    %75 = vector.shape_cast %74 : vector<128x16xf32> to vector<1x8x16x16xf32>
    %c0_89 = arith.constant 0 : index
    %c0_90 = arith.constant 0 : index
    %c0_91 = arith.constant 0 : index
    %c0_92 = arith.constant 0 : index
    %76 = vector.load %arg14[%c0_89, %c0_90, %c0_91, %c0_92] : memref<1x8x16x16xf32, #tpu.memory_space<vmem>>, vector<1x8x16x16xf32>
    tpu.vector_store %arg14[%c0_89, %c0_90, %c0_91, %c0_92], %75 {strides = array<i32>} : memref<1x8x16x16xf32, #tpu.memory_space<vmem>>, vector<1x8x16x16xf32>,
    return
  }
  func.func @transform_0(%arg0: i32, %arg1: i32) -> (i32, i32, i32, i32) {
    %c0_i32 = arith.constant 0 : i32
    %c0_i32_0 = arith.constant 0 : i32
    %c0_i32_1 = arith.constant 0 : i32
    return %arg0, %arg1, %c0_i32, %c0_i32_0 : i32, i32, i32, i32
  }
  func.func @transform_1(%arg0: i32, %arg1: i32) -> (i32, i32, i32, i32) {
    %c8_i32 = arith.constant 8 : i32
    %0 = arith.muli %arg1, %c8_i32 : i32
    %c1_i32 = arith.constant 1 : i32
    %1 = arith.subi %0, %c1_i32 : i32
    %c0_i32 = arith.constant 0 : i32
    %2 = arith.maxsi %1, %c0_i32 : i32
    %c0_i32_0 = arith.constant 0 : i32
    %c0_i32_1 = arith.constant 0 : i32
    %c0_i32_2 = arith.constant 0 : i32
    return %arg0, %2, %c0_i32_0, %c0_i32_1 : i32, i32, i32, i32
  }
  func.func @transform_2(%arg0: i32, %arg1: i32) -> (i32, i32, i32, i32) {
    %c1_i32 = arith.constant 1 : i32
    %0 = arith.addi %arg1, %c1_i32 : i32
    %c8_i32 = arith.constant 8 : i32
    %1 = arith.muli %0, %c8_i32 : i32
    %c15_i32 = arith.constant 15 : i32
    %2 = arith.minsi %1, %c15_i32 : i32
    %c0_i32 = arith.constant 0 : i32
    %c0_i32_0 = arith.constant 0 : i32
    %c0_i32_1 = arith.constant 0 : i32
    return %arg0, %2, %c0_i32, %c0_i32_0 : i32, i32, i32, i32
  }
  func.func @transform_3(%arg0: i32, %arg1: i32) -> (i32, i32) {
    %c0_i32 = arith.constant 0 : i32
    %c0_i32_0 = arith.constant 0 : i32
    %c0_i32_1 = arith.constant 0 : i32
    return %c0_i32, %c0_i32_0 : i32, i32
  }
  func.func @transform_4(%arg0: i32, %arg1: i32) -> (i32, i32) {
    %c0_i32 = arith.constant 0 : i32
    %c0_i32_0 = arith.constant 0 : i32
    %c0_i32_1 = arith.constant 0 : i32
    return %c0_i32, %c0_i32_0 : i32, i32
  }
  func.func @transform_5(%arg0: i32, %arg1: i32) -> (i32, i32) {
    %c0_i32 = arith.constant 0 : i32
    %c0_i32_0 = arith.constant 0 : i32
    %c0_i32_1 = arith.constant 0 : i32
    return %c0_i32, %c0_i32_0 : i32, i32
  }
  func.func @transform_6(%arg0: i32, %arg1: i32) -> (i32, i32) {
    %c0_i32 = arith.constant 0 : i32
    %c0_i32_0 = arith.constant 0 : i32
    %c0_i32_1 = arith.constant 0 : i32
    return %c0_i32, %c0_i32_0 : i32, i32
  }
  func.func @transform_7(%arg0: i32, %arg1: i32) -> (i32, i32) {
    %c0_i32 = arith.constant 0 : i32
    %c0_i32_0 = arith.constant 0 : i32
    %c0_i32_1 = arith.constant 0 : i32
    return %c0_i32, %c0_i32_0 : i32, i32
  }
  func.func @transform_8(%arg0: i32, %arg1: i32) -> (i32, i32) {
    %c0_i32 = arith.constant 0 : i32
    %c0_i32_0 = arith.constant 0 : i32
    %c0_i32_1 = arith.constant 0 : i32
    return %c0_i32, %c0_i32_0 : i32, i32
  }
  func.func @transform_9(%arg0: i32, %arg1: i32) -> (i32, i32) {
    %c0_i32 = arith.constant 0 : i32
    %c0_i32_0 = arith.constant 0 : i32
    %c0_i32_1 = arith.constant 0 : i32
    return %c0_i32, %c0_i32_0 : i32, i32
  }
  func.func @transform_10(%arg0: i32, %arg1: i32) -> (i32, i32) {
    %c0_i32 = arith.constant 0 : i32
    %c0_i32_0 = arith.constant 0 : i32
    %c0_i32_1 = arith.constant 0 : i32
    return %c0_i32, %c0_i32_0 : i32, i32
  }
  func.func @transform_11(%arg0: i32, %arg1: i32) -> (i32, i32) {
    %c0_i32 = arith.constant 0 : i32
    %c0_i32_0 = arith.constant 0 : i32
    %c0_i32_1 = arith.constant 0 : i32
    return %c0_i32, %c0_i32_0 : i32, i32
  }
  func.func @transform_12(%arg0: i32, %arg1: i32) -> (i32, i32, i32, i32) {
    %c0_i32 = arith.constant 0 : i32
    %c0_i32_0 = arith.constant 0 : i32
    %c0_i32_1 = arith.constant 0 : i32
    return %arg0, %arg1, %c0_i32, %c0_i32_0 : i32, i32, i32, i32
  }
}

</mosaic_0001>

<bundles_post_ra>
// kernel: tpu_custom_call.1
= control target key start
LH: loop header
LB: loop body
LE: loop exit
PB: predicated region body
PF: predicated region fallthrough
CT: control target
= control target key end

     0   :  { %s5456_s0 = inlined_call_operand.hbm [shape: bf16[2,16,16,16], index: 0, kind: input, shape index: {}]   ;;  %s5457_s1 = inlined_call_operand.hbm [shape: bf16[2,16,16,16], index: 1, kind: input, shape index: {}]   ;;  %s5458_s2 = inlined_call_operand.hbm [shape: bf16[2,16,16,16], index: 2, kind: input, shape index: {}]   ;;  %s5459_s3 = inlined_call_operand.vmem [shape: bf16[16,4], index: 3, kind: input, shape index: {}]   ;;  %s5460_s4 = inlined_call_operand.vmem [shape: f32[1,4], index: 4, kind: input, shape index: {}]   ;;  %s5461_s5 = inlined_call_operand.vmem [shape: f32[1,4], index: 5, kind: input, shape index: {}]   ;;  %s5462_s6 = inlined_call_operand.vmem [shape: bf16[36,4], index: 6, kind: input, shape index: {}]   ;;  %s5463_s7 = inlined_call_operand.vmem [shape: f32[1,4], index: 7, kind: input, shape index: {}]   ;;  %s5464_s8 = inlined_call_operand.vmem [shape: f32[1,4], index: 8, kind: input, shape index: {}]   ;;  %s5465_s9 = inlined_call_operand.vmem [shape: bf16[4,16], index: 9, kind: input, shape index: {}]   ;;  %s5466_s10 = inlined_call_operand.vmem [shape: f32[1,16], index: 10, kind: input, shape index: {}]   ;;  %s5467_s11 = inlined_call_operand.vmem [shape: f32[1,16], index: 11, kind: input, shape index: {}]   ;;  %s5468_s12 = inlined_call_operand.hbm [shape: f32[2,16,16,16], index: 12, kind: output, shape index: {}]  }
   0x1   :  { %5492 = sst [smem:[#allocation27_spill]] %s5456_s0 }
   0x2   :  { %5493 = sst [smem:[#allocation28_spill]] %s5457_s1 }
   0x3   :  { %5494 = sst [smem:[#allocation29_spill]] %s5458_s2 }
   0x4   :  { %5495 = sst [smem:[#allocation30_spill]] %s5459_s3 }
   0x5   :  { %5496 = sst [smem:[#allocation31_spill]] %s5460_s4 }
   0x6   :  { %5497 = sst [smem:[#allocation32_spill]] %s5461_s5 }
   0x7   :  { %5498 = sst [smem:[#allocation33_spill]] %s5462_s6 }
   0x8   :  { %5499 = sst [smem:[#allocation34_spill]] %s5463_s7 }
   0x9   :  { %5500 = sst [smem:[#allocation35_spill]] %s5464_s8 }
   0xa   :  { %5501 = sst [smem:[#allocation36_spill]] %s5465_s9 }
   0xb   :  { %5502 = sst [smem:[#allocation37_spill]] %s5466_s10 }
   0xc   :  { %5503 = sst [smem:[#allocation38_spill]] %s5467_s11 }
   0xd   :  { %5504 = sst [smem:[#allocation39_spill]] %s5468_s12 }
   0xe   :  { %17 = vsyncpa [#allocation5], 0 }
   0xf   :  { %19 = vsyncpa [#allocation5 + $0x1], 0 }
  0x10   :  { %20 = vsyncpa [#allocation8], 0 }
  0x11   :  { %22 = vsyncpa [#allocation8 + $0x1], 0 }
  0x12   :  { %23 = vsyncpa [#allocation6], 0 }
  0x13   :  { %25 = vsyncpa [#allocation6 + $0x1], 0  ;;  %s4357_s21 = smov 0   ;;  %s4359_s22 = smov 0  }
  0x14   :  { %s4361_s23 = smov 0   ;;  %s4363_s24 = smov 0  }
  0x15   :  { %s4365_s25 = smov 0   ;;  %s4367_s26 = smov 0  }
  0x16   :  { %s4369_s27 = smov 0   ;;  %s4371_s28 = smov 0  }
  0x17   :  { %s4373_s29 = smov 0   ;;  %s4375_s30 = smov 0  }
  0x18   :  { %s4377_s13 = smov 0   ;;  %s4379_s14 = smov 0  }
  0x19   :  { %s4381_s15 = smov 0   ;;  %s4383_s16 = smov 0  }
  0x1a LB: > { %5505 = sst [smem:[#allocation15_spill]] %s4233_s25  ;;  %s4428_s17 = sadd.s32 4294967295, %s4269_s16   ;;  %s4269_s16 = sphi %s4383_s16, %s31_s16   ;;  %s4265_s15 = sphi %s4381_s15, %s5593_s15   ;;  %s4261_s14 = sphi %s4379_s14, %s5592_s14   ;;  %s4257_s13 = sphi %s4377_s13, %s5591_s13   ;;  %s4253_s30 = sphi %s4375_s30, %s5590_s30   ;;  %s4249_s29 = sphi %s4373_s29, %s5589_s29   ;;  %s4245_s28 = sphi %s4371_s28, %s5600_s28   ;;  %s4241_s27 = sphi %s4369_s27, %s5599_s27   ;;  %s4237_s26 = sphi %s4367_s26, %s5598_s26   ;;  %s4233_s25 = sphi %s4365_s25, %s5597_s25   ;;  %s4229_s24 = sphi %s4363_s24, %s5586_s24   ;;  %s4225_s23 = sphi %s4361_s23, %s5596_s23   ;;  %s4221_s22 = sphi %s4359_s22, %s5595_s22   ;;  %s4217_s21 = sphi %s4357_s21, %s5594_s21  }
  0x1b   : > { %5506 = sst [smem:[#allocation16_spill]] %s4249_s29  ;;  %s40_s18 = sadd.s32 1, %s4261_s14 }
  0x1c   : > { %5507 = sst [smem:[#allocation17_spill]] %s4253_s30  ;;  %p41_p0 = scmp.ge.s32.totalorder %s40_s18, 2 }
  0x1d   : > { %5508 = sst [smem:[#allocation18_spill]] %s4257_s13  ;;  %s43_s19 = sadd.s32 1, %s4265_s15 }
  0x1e   : > { %5509 = sst [smem:[#allocation19_spill]] %s4261_s14  ;;  %p5480_p1 = scmp.eq.s32.totalorder %s4269_s16, 0 }
  0x1f   : > { %5510 = sst [smem:[#allocation20_spill]] %s4265_s15  ;;  %p5479_p2 = scmp.eq.s32.totalorder %s4428_s17, 0 }
  0x20   : > { %s5602_s18 = smov (%p41_p0, %s40_s18), 0  ;;  %s5604_s19 = smov (!%p41_p0, %s43_s19), %s4265_s15 }
  0x21   : > { %5511 = sst [smem:[#allocation21_spill]] %s5602_s18  ;;  %s48_s20 = ssub.s32 %s4261_s14, %s5602_s18 }
  0x22   : > { %s3361_s12 = sshll.u32 %s4261_s14, 3  ;;  %p45_p3 = scmp.ge.s32.totalorder %s5604_s19, 2 }
  0x23   : > { %s3362_s13 = sadd.s32 4294967295, %s3361_s12  ;;  %s3363_s11 = sshll.u32 %s5602_s18, 3 }
  0x24   : > { %p77_p4 = scmp.gt.s32.totalorder %s3362_s13, 0  ;;  %s5606_s19 = smov (%p45_p3, %s5604_s19), 0 }
  0x25   : > { %5512 = sst [smem:[#allocation22_spill]] %s5606_s19  ;;  %s4445_s10 = ssub.s32 %s4265_s15, %s5606_s19 }
  0x26   : > { %s5608_s13 = smov (!%p77_p4, %s3362_s13), 0  ;;  %5513 = sst [smem:[#allocation23_spill]] %s4445_s10 }
  0x27   : > { %s3364_s8 = sadd.s32 4294967295, %s3363_s11  ;;  %s4448_s7 = sor.u32 %s48_s20, %s4445_s10 }
  0x28   : > { %p81_p5 = scmp.gt.s32.totalorder %s3364_s8, 0  ;;  %s88_s9 = sadd.s32 1, %s4237_s26 }
  0x29   : > { %p95_p7 = scmp.ne.s32.totalorder %s4237_s26, %s4233_s25  ;;  %p101_p8 = scmp.ne.s32.totalorder %s4233_s25, %s4229_s24 }
  0x2a   : > { %s5610_s8 = smov (!%p81_p5, %s3364_s8), 0  ;;  %s4456_s19 = sadd.s32 8, %s3361_s12 }
  0x2b   : > { %s84_s18 = ssub.s32 %s5608_s13, %s5610_s8  ;;  %p4461_p9 = por %p95_p7, %p5480_p1 }
  0x2c   : > { %s85_s6 = sor.u32 %s84_s18, %s4445_s10  ;;  %p4467_p11 = por %p101_p8, %p5479_p2 }
  0x2d   : > { %p86_p10 = scmp.eq.s32.totalorder %s85_s6, 0  ;;  %s4472_s24 = sadd.s32 8, %s3363_s11 }
  0x2e   : > { %s5515_s30 = scalar_select %p4467_p11, 1, 0 }
  0x2f   : > { %s4475_s8 = scalar_select %p86_p10, %s4237_s26, %s88_s9  }
  0x30   : > { %5516 = sst [smem:[#allocation24_spill]] %s5515_s30  ;;  %p5478_p0 = scmp.lt.s32.totalorder %s4269_s16, 4 }
  0x31   : > { %5517 = sst [smem:[#allocation25_spill]] %s4475_s8  ;;  %s4480_s12 = sshll.u32 %s4265_s15, 5 }
  0x32   : > { %s429_s6 = sand.u32 1, %s4269_s16   ;;  %s431_s18 = sand.u32 1, %s4237_s26  }
  0x33   : > { %s3374_s5 = sshll.u32 %s431_s18, 3  ;;  %s3377_s4 = sshll.u32 %s5608_s13, 1 }
  0x34   : > { %s443_s3 = sadd.s32 %s3377_s4, %s4480_s12  ;;  %s433_s30 = scalar_lea.vmem [#allocation7], %s3374_s5 }
  0x35   : > { %s446_s25 = sshll.u32 %s433_s30, 4  ;;  %s3379_s2 = sshll.u32 %s443_s3, 6  ;;  %s4485_s25 = int_to_ptr.vmem [resolvable:$true] %s446_s25 }
  0x36   : > { %s5518_s1 = sld [smem:[#allocation28_spill]]  ;;  %p4496_p3 = pnand %p5478_p0, %p4461_p9 }
  0x37   : > { %s4502_s3 = scalar_lea.sflag [#allocation8], %s429_s6 }
  0x38   : > { %p4027_p8 = pneg %p4496_p3 }
  0x3c   : > { %s4490_s9 = scalar_lea.hbm %s5518_s1, %s3379_s2  ;;  %s4030_s10 = scalar_lea.hbm %s5518_s1, 4096 }
  0x3d   : > { %s4025_s4 = scalar_lea.hbm %s4490_s9, 128  ;;  %p4031_p9 = scmp.lt.u32.totalorder %s4490_s9, %s5518_s1 }
  0x3e   : > { %p4026_p7 = scmp.ne.s32.totalorder %s4490_s9, %s4025_s4  ;;  %p4032_p12 = scmp.lt.u32.totalorder %s4030_s10, %s4025_s4 }
  0x3f   : > { %p4034_p2 = scmp.lt.u32.totalorder %s4025_s4, %s4490_s9 }
  0x40   : > { %p4028_p10 = pnand %p4027_p8, %p4026_p7  ;;  %p4033_p0 = por %p4032_p12, %p4031_p9 }
  0x42   : > { %p4029_p13 = pneg %p4028_p10  ;;  %p4035_p1 = por %p4034_p2, %p4033_p0 }
  0x44   : > { %p4036_p6 = pnand %p4035_p1, %p4029_p13 }
  0x46   : > { %4039 = shalt.err (!%p4036_p6)
}
  0x47   : > { %s4040_s20 = scalar_lea.vmem %s4485_s25, 128  ;;  %s4271_s6 = smov [#allocation7]  }
  0x48   : > { %p4041_p7 = scmp.ne.s32.totalorder %s4485_s25, %s4040_s20  ;;  %s4045_s11 = sshll.u32 %s4271_s6, 4  ;;  %s4046_s11 = int_to_ptr.vmem [resolvable:$false] %s4045_s11 }
  0x49   : > { %s4047_s2 = scalar_lea.vmem %s4046_s11, 256  ;;  %p4048_p5 = scmp.lt.s32.totalorder %s4485_s25, %s4046_s11 }
  0x4a   : > { %p4043_p10 = pnand %p4041_p7, %p4027_p8  ;;  %p4049_p12 = scmp.lt.s32.totalorder %s4047_s2, %s4040_s20 }
  0x4c   : > { %p4044_p4 = pneg %p4043_p10  ;;  %p4050_p9 = por %p4049_p12, %p4048_p5 }
  0x4e   : > { %p4051_p2 = pnand %p4050_p9, %p4044_p4 }
  0x50   : > { %4054 = shalt.err (!%p4051_p2)
}
  0x51   : > { %s5481_s4 = smov 64   ;;  %s5483_s5 = smov 4  }
  0x52   : > { %3742 = dma.hbm_to_vmem [thread:$0]  (!%p4496_p3), %s4490_s9, 128, %s4485_s25, %s4502_s3, %s5481_s4, %s5481_s4, %s5483_s5  }
  0x53   : > { %p5520_p1 = scmp.lt.s32.totalorder %s4269_s16, 5  ;;  %p5521_p6 = scmp.ge.s32.totalorder %s4269_s16, 1 }
  0x54   : > { %s3360_s30 = sadd.s32 4294967294, %s4269_s16   ;;  %s52_s13 = sadd.s32 1, %s4249_s29 }
  0x55   : > { %p4537_p13 = pnand %p5521_p6, %p5520_p1  ;;  %p5523_p0 = scmp.eq.s32.totalorder %s4448_s7, 0 }
  0x56   : > { %p59_p4 = scmp.ne.s32.totalorder %s4249_s29, %s4245_s28  ;;  %p65_p5 = scmp.ne.s32.totalorder %s4245_s28, %s4241_s27 }
  0x57   : > { %s4546_s20 = scalar_select %p5523_p0, %s4249_s29, %s52_s13  }
  0x58   : > { %p352_p8 = scmp.eq.s32.totalorder %s4428_s17, 3  ;;  %p358_p7 = scmp.eq.s32.totalorder %s3360_s30, 3 }
  0x59   : > { %5524 = sst [smem:[#allocation26_spill]] %s4546_s20  ;;  %p5525_p10 = scmp.eq.s32.totalorder %s4269_s16, 0 }
  0x5a   : > { %p5527_p3 = scmp.eq.s32.totalorder %s4428_s17, 0  ;;  %p4565_p2 = por %p352_p8, %p59_p4 }
  0x5b   : > { %p4555_p12 = por %p5525_p10, %p59_p4  ;;  %p4569_p1 = por %p358_p7, %p65_p5 }
  0x5c   : > { %p4561_p9 = por %p5527_p3, %p65_p5  ;;  %s405_s6 = sand.u32 1, %s4249_s29  }
  0x5d   : > { %s5529_s7 = scalar_select %p4565_p2, 1, 0 }
  0x5e   : > { %s5528_s9 = scalar_select %p4561_p9, 1, 0 }
  0x5f   : > { %s5530_s18 = scalar_select %p4569_p1, 1, 0 }
  0x60   : > { %s3597_s11 = sshll.u32 %s4261_s14, 4  ;;  %s3369_s2 = sshll.u32 %s405_s6, 6 }
  0x61   : > { %s416_s30 = sadd.s32 %s3597_s11, %s4480_s12  ;;  %s409_s4 = scalar_lea.vmem [#allocation4], %s3369_s2 }
  0x62   : > { %s3373_s13 = sshll.u32 %s416_s30, 6  ;;  %s419_s5 = sshll.u32 %s409_s4, 4  ;;  %s4581_s5 = int_to_ptr.vmem [resolvable:$true] %s419_s5 }
  0x63   : > { %s5531_s0 = sld [smem:[#allocation27_spill]]  ;;  %p5532_p6 = scmp.lt.s32.totalorder %s4269_s16, 4 }
  0x64   : > { %s4591_s4 = scalar_lea.sflag [#allocation5], %s405_s6 }
  0x65   : > { %p4587_p0 = pnand %p5532_p6, %p4555_p12 }
  0x67   : > { %p4057_p5 = pneg %p4587_p0 }
  0x69   : > { %s4579_s20 = scalar_lea.hbm %s5531_s0, %s3373_s13  ;;  %s4060_s25 = scalar_lea.hbm %s5531_s0, 4096 }
  0x6a   : > { %s4055_s11 = scalar_lea.hbm %s4579_s20, 1024  ;;  %p4061_p10 = scmp.lt.u32.totalorder %s4579_s20, %s5531_s0 }
  0x6b   : > { %p4056_p4 = scmp.ne.s32.totalorder %s4579_s20, %s4055_s11  ;;  %p4062_p12 = scmp.lt.u32.totalorder %s4060_s25, %s4055_s11 }
  0x6c   : > { %p4064_p6 = scmp.lt.u32.totalorder %s4055_s11, %s4579_s20 }
  0x6d   : > { %p4058_p8 = pnand %p4057_p5, %p4056_p4  ;;  %p4063_p3 = por %p4062_p12, %p4061_p10 }
  0x6f   : > { %p4059_p7 = pneg %p4058_p8  ;;  %p4065_p1 = por %p4064_p6, %p4063_p3 }
  0x71   : > { %p4066_p2 = pnand %p4065_p1, %p4059_p7 }
  0x73   : > { %4069 = shalt.err (!%p4066_p2)
}
  0x74   : > { %s4070_s6 = scalar_lea.vmem %s4581_s5, 1024  ;;  %s4274_s13 = smov [#allocation4]  }
  0x75   : > { %p4071_p4 = scmp.ne.s32.totalorder %s4581_s5, %s4070_s6  ;;  %s4075_s1 = sshll.u32 %s4274_s13, 4  ;;  %s4076_s1 = int_to_ptr.vmem [resolvable:$false] %s4075_s1 }
  0x76   : > { %s4077_s15 = scalar_lea.vmem %s4076_s1, 2048  ;;  %p4078_p9 = scmp.lt.s32.totalorder %s4581_s5, %s4076_s1 }
  0x77   : > { %p4073_p8 = pnand %p4071_p4, %p4057_p5  ;;  %p4079_p10 = scmp.lt.s32.totalorder %s4077_s15, %s4070_s6 }
  0x79   : > { %p4074_p11 = pneg %p4073_p8  ;;  %p4080_p12 = por %p4079_p10, %p4078_p9 }
  0x7b   : > { %p4081_p3 = pnand %p4080_p12, %p4074_p11 }
  0x7d   : > { %4084 = shalt.err (!%p4081_p3)
}
  0x7e   : > { %s5534_s11 = smov 4   ;;  %s5535_s25 = smov 64  }
  0x7f   : > { %s5536_s2 = sld [smem:[#allocation23_spill]]  ;;  %p5537_p11 = scmp.lt.s32.totalorder %s4456_s19, 15 }
  0x80   : > { %3739 = dma.hbm_to_vmem [thread:$0]  (!%p4587_p0), %s4579_s20, 1024, %s4581_s5, %s4591_s4, %s5535_s25, %s5535_s25, %s5534_s11  }
  0x81   : > { %s5612_s19 = smov (!%p5537_p11, %s4456_s19), 15  ;;  %p5538_p9 = scmp.lt.s32.totalorder %s4472_s24, 15 }
  0x82   : > { %s124_s14 = sadd.s32 1, %s4225_s23  ;;  %p131_p2 = scmp.ne.s32.totalorder %s4225_s23, %s4221_s22 }
  0x83   : > { %s5614_s24 = smov (!%p5538_p9, %s4472_s24), 15  ;;  %p137_p1 = scmp.ne.s32.totalorder %s4221_s22, %s4217_s21 }
  0x84   : > { %s120_s30 = ssub.s32 %s5612_s19, %s5614_s24  ;;  %p5539_p5 = scmp.eq.s32.totalorder %s4269_s16, 0 }
  0x85   : > { %s121_s6 = sor.u32 %s120_s30, %s5536_s2  ;;  %p5541_p4 = scmp.eq.s32.totalorder %s4428_s17, 0 }
  0x86   : > { %p4636_p7 = por %p131_p2, %p5539_p5  ;;  %p122_p6 = scmp.eq.s32.totalorder %s121_s6, 0 }
  0x87   : > { %p4642_p8 = por %p137_p1, %p5541_p4  ;;  %s458_s20 = sand.u32 1, %s4225_s23  }
  0x88   : > { %s3382_s4 = sshll.u32 %s5612_s19, 1  ;;  %s3380_s24 = sshll.u32 %s458_s20, 3 }
  0x89   : > { %s5542_s5 = scalar_select %p4642_p8, 1, 0 }
  0x8a   : > { %s4648_s1 = scalar_select %p122_p6, %s4225_s23, %s124_s14  }
  0x8b   : > { %s470_s15 = sadd.s32 %s3382_s4, %s4480_s12  ;;  %s5543_s0 = sld [smem:[#allocation29_spill]] }
  0x8c   : > { %s3384_s21 = sshll.u32 %s470_s15, 6  ;;  %s460_s6 = scalar_lea.vmem [#allocation9], %s3380_s24 }
  0x8d   : > { %s473_s8 = sshll.u32 %s460_s6, 4  ;;  %p5544_p0 = scmp.lt.s32.totalorder %s4269_s16, 4  ;;  %s4656_s8 = int_to_ptr.vmem [resolvable:$true] %s473_s8 }
  0x8f   : > { %p4662_p10 = pnand %p5544_p0, %p4636_p7 }
  0x91   : > { %s4654_s29 = scalar_lea.hbm %s5543_s0, %s3384_s21  ;;  %p4087_p3 = pneg %p4662_p10 }
  0x92   : > { %s4085_s12 = scalar_lea.hbm %s4654_s29, 128  ;;  %s4090_s4 = scalar_lea.hbm %s5543_s0, 4096 }
  0x93   : > { %p4086_p12 = scmp.ne.s32.totalorder %s4654_s29, %s4085_s12  ;;  %p4091_p2 = scmp.lt.u32.totalorder %s4654_s29, %s5543_s0 }
  0x94   : > { %p4092_p1 = scmp.lt.u32.totalorder %s4090_s4, %s4085_s12  ;;  %p4094_p7 = scmp.lt.u32.totalorder %s4085_s12, %s4654_s29 }
  0x95   : > { %p4088_p11 = pnand %p4087_p3, %p4086_p12 }
  0x96   : > { %p4093_p5 = por %p4092_p1, %p4091_p2 }
  0x97   : > { %p4089_p9 = pneg %p4088_p11 }
  0x98   : > { %p4095_p6 = por %p4094_p7, %p4093_p5 }
  0x9a   : > { %p4096_p4 = pnand %p4095_p6, %p4089_p9 }
  0x9c   : > { %4099 = shalt.err (!%p4096_p4)
}
  0x9d   : > { %s4100_s15 = scalar_lea.vmem %s4656_s8, 128  ;;  %s4275_s21 = smov [#allocation9]  }
  0x9e   : > { %p4101_p0 = scmp.ne.s32.totalorder %s4656_s8, %s4100_s15  ;;  %s4105_s2 = sshll.u32 %s4275_s21, 4  ;;  %s4106_s2 = int_to_ptr.vmem [resolvable:$false] %s4105_s2 }
  0x9f   : > { %s4107_s30 = scalar_lea.vmem %s4106_s2, 256  ;;  %p4108_p8 = scmp.lt.s32.totalorder %s4656_s8, %s4106_s2 }
  0xa0   : > { %p4103_p12 = pnand %p4101_p0, %p4087_p3  ;;  %p4109_p2 = scmp.lt.s32.totalorder %s4107_s30, %s4100_s15 }
  0xa2   : > { %p4104_p11 = pneg %p4103_p12  ;;  %p4110_p1 = por %p4109_p2, %p4108_p8 }
  0xa4   : > { %p4111_p5 = pnand %p4110_p1, %p4104_p11 }
  0xa6   : > { %4114 = shalt.err (!%p4111_p5)
}
  0xa7   : > { %3745 = dma.hbm_to_vmem [thread:$0]  (!%p4662_p10), %s4654_s29, 128, %s4656_s8, %s4502_s3, %s5535_s25, %s5535_s25, %s5534_s11  }
  0xa8   : > { %485 = sbr.rel (%p4537_p13) target bundleno = 1687 (0x697), region = 68  ;;  %s4698_s6 = sand.u32 (!%p4537_p13), 1, %s4245_s28  }
  0xa9   : > { %s3386_s12 = sshll.u32 (!%p4537_p13), %s4698_s6, 6  ;;  %s488_s14 = scalar_lea.sflag (!%p4537_p13), [#allocation5], %s4698_s6 }
  0xaa   : > { %s4702_s20 = scalar_lea.vmem (!%p4537_p13), [#allocation4], %s3386_s12  ;;  %p5546_p8 = scmp.ne.s32.totalorder (!%p4537_p13), %s5528_s9, 0 }
  0xaf   : > { %4200 = dma.done.wait (%p5546_p8), %s488_s14, 1024  }
  0xb0   : > { %4202 = vsyncadd (%p5546_p8), %s488_s14, 4294966272  ;;  %s5547_s29 = sld [smem:[#allocation15_spill]]  ;;  %s5548_s8 = sld [smem:[#allocation24_spill]] }
  0xb1   : > { %s496_s3 = sand.u32 1, %s4428_s17  }
  0xb2   : > { %s497_s25 = scalar_lea.sflag [#allocation8], %s496_s3 }
  0xb6   : > { %s498_s10 = sand.u32 1, %s5547_s29   ;;  %p5549_p13 = scmp.ne.s32.totalorder %s5548_s8, 0 }
  0xb7   : > { %s4710_s11 = sshll.u32 %s498_s10, 3 }
  0xb8   : > { %s500_s19 = scalar_lea.vmem [#allocation7], %s4710_s11 }
  0xb9   : > { %4204 = dma.done.wait (%p5549_p13), %s497_s25, 128  }
  0xba   : > { %4206 = vsyncadd (%p5549_p13), %s497_s25, 4294967168  ;;  %s507_s4 = sand.u32 1, %s4221_s22   ;;  %p5550_p10 = scmp.ne.s32.totalorder %s5542_s5, 0 }
  0xbb   : > { %s4718_s9 = sshll.u32 %s507_s4, 3 }
  0xbc   : > { %s509_s13 = scalar_lea.vmem [#allocation9], %s4718_s9 }
  0xbd   : > { %4208 = dma.done.wait (%p5550_p10), %s497_s25, 128  }
  0xbe   : > { %4210 = vsyncadd (%p5550_p10), %s497_s25, 4294967168  ;;  %s3389_s17 = sshll.u32 %s4698_s6, 7  ;;  %s5551_s21 = sld [smem:[#allocation30_spill]]  ;;  %v4730_v1 = vld [vmem:[%s4702_s20] sm:$0xff]   ;;  %vm635_vm0 = vcmask 130048   ;;  %v4736_v3 = vld [vmem:[%s4702_s20 + $0x8] sm:$0xff]  }
  0xbf   : > { %v4733_v2 = vld [vmem:[%s4702_s20 + $0x20] sm:$0xff]   ;;  %v4739_v4 = vld [vmem:[%s4702_s20 + $0x28] sm:$0xff]   ;;  %v4742_v5 = vld [vmem:[%s4702_s20 + $0x10] sm:$0xff]   ;;  %3656 = vmatprep.mubr.msk.bf16.mxu0 %vm635_vm0, %v4730_v1  ;;  %vm867_vm1 = vsmask.f32 256  ;;  %vm1039_vm2 = vcmask 24576  }
  0xc0   : > { %v4745_v6 = vld [vmem:[%s4702_s20 + $0x30] sm:$0xff]   ;;  %3664 = vmatprep.mubr.msk.bf16.mxu1 %vm635_vm0, %v4733_v2  ;;  %v4760_v7 = vld [vmem:[%s4702_s20 + $0x18] sm:$0xff]   ;;  %vm4771_vm3 = vmand %vm1039_vm2, %vm867_vm1  ;;  %vm1032_vm4 = vsmask.f32 7938  ;;  %s5556_s30 = sld [smem:[#allocation31_spill]]  ;;  %vm1031_vm6 = vcmask 27648  }
  0xc1   : > { %v4763_v8 = vld [vmem:[%s4702_s20 + $0x38] sm:$0xff]   ;;  %v1093_v10 = vld [vmem:[#allocation2] sm:$0x1]  ;;  %v1120_v12 = vld [vmem:[#allocation2 + $0x6c] sm:$0x1]  ;;  %s5557_s20 = sld [smem:[#allocation32_spill]] }
  0xc2   : > { %v1094_v11 = vsel %vm4771_vm3, 0, %v1093_v10  ;;  %vm4779_vm5 = vmand %vm1039_vm2, %vm1032_vm4  ;;  %v1124_v14 = vld [vmem:[#allocation2 + $0x8] sm:$0x1]  ;;  %v1121_v15 = vsel %vm4771_vm3, 0, %v1120_v12  ;;  %v1151_v17 = vld [vmem:[#allocation2 + $0x74] sm:$0x1] }
  0xc3   : > { %1095 = vst [vmem:[#allocation2] sm:$0x1] %v1094_v11  ;;  %v1125_v16 = vsel %vm4779_vm5, 0, %v1124_v14  ;;  %1122 = vst [vmem:[#allocation2 + $0x6c] sm:$0x1] %v1121_v15  ;;  %v1152_v18 = vsel %vm4779_vm5, 0, %v1151_v17 }
  0xc4   : > { %v3881_v0 = vld [vmem:[%s5551_s21] sm:$0xff]   ;;  %1126 = vst [vmem:[#allocation2 + $0x8] sm:$0x1] %v1125_v16  ;;  %1153 = vst [vmem:[#allocation2 + $0x74] sm:$0x1] %v1152_v18  ;;  %s4971_s29 = scalar_lea.vmem [#allocation10], %s3389_s17 }
  0xc5   : > { %3654 = vmatprep.subr.bf16.mxu0 %v3881_v0  ;;  %3724 = vmatprep.subr.bf16.mxu1 %v3881_v0  ;;  %vm868_vm7 = vsmask.f32 4368  ;;  %vm4831_vm8 = vmand %vm1031_vm6, %vm1032_vm4  ;;  %s5562_s8 = sld [smem:[#allocation17_spill]] }
  0xc6   : > { %3655 = vmatpush3.bf16.msra.mxu0 %v3881_v0  ;;  %3725 = vmatpush3.bf16.msra.mxu1 %v3881_v0  ;;  %v4792_v19 = vld [vmem:[%s5556_s30] ss:$0 sm:$0xff]  ;;  %vm4855_vm9 = vmor %vm867_vm1, %vm868_vm7 }
  0xc7   : > { %v4797_v21 = vld [vmem:[%s5557_s20] ss:$0 sm:$0xff] }
  0xc9   : > { %3657 = vmatmul.mubr.msk.bf16.vlgmr.msra.gmra.mrb[0].mxu0 %vm635_vm0, %v4736_v3  ;;  %3665 = vmatmul.mubr.msk.bf16.vlgmr.msra.gmra.mrb[0].mxu1 %vm635_vm0, %v4739_v4 }
  0xca   : > { %3660 = vmatprep.mubr.msk.bf16.mxu0 %vm635_vm0, %v4742_v5  ;;  %3668 = vmatprep.mubr.msk.bf16.mxu1 %vm635_vm0, %v4745_v6 }
  0xcb   : > { %p3425_p3 = scmp.le.s32.totalorder %s5562_s8, 0 }
  0xcc   : > { %s5563_s25 = sld [smem:[#allocation30_spill]] (!%p3425_p3)  ;;  %vm4277_vm10 = vmmov (!%p3425_p3), 0   ;;  %s5564_s24 = sld [smem:[#allocation31_spill]] (!%p3425_p3) }
  0xcd   : > { %s5565_s5 = sld [smem:[#allocation32_spill]] (!%p3425_p3) }
  0xd1   : > { %3661 = vmatmul.mubr.msk.bf16.gmra.mrb[4].mxu0 %vm635_vm0, %v4760_v7  ;;  %3669 = vmatmul.mubr.msk.bf16.gmra.mrb[4].mxu1 %vm635_vm0, %v4763_v8 }
  0xd2   : > { %v3429_v13 = vld [vmem:[%s5564_s24] ss:$0 sm:$0xff] (!%p3425_p3) }
 0x19c   : > { %v3658_v20 = vpop.f32.mrb[0].mxu0  ;;  %v3666_v22 = vpop.f32.mrb[0].mxu1 }
 0x19d   : > { %v766_v23 = vmul.f32 %v3658_v20, %v4792_v19  ;;  %v774_v24 = vmul.f32 %v3666_v22, %v4792_v19  ;;  %v694_v25 = vpop.f32.mrb[1].mxu0  ;;  %v726_v26 = vpop.f32.mrb[1].mxu1 }
 0x19e   : > { %v764_v27 = vmul.f32 %v4792_v19, %v694_v25  ;;  %v772_v28 = vmul.f32 %v4792_v19, %v726_v26  ;;  %v3659_v29 = vpop.f32.mrb[2].mxu0  ;;  %v3667_v30 = vpop.f32.mrb[2].mxu1  ;;  %v1044_v26 = vld [vmem:[#allocation2 + $0x18] sm:$0xf] }
 0x19f   : > { %v789_v31 = vadd.f32 %v4797_v21, %v766_v23  ;;  %v797_v32 = vadd.f32 %v4797_v21, %v774_v24  ;;  %v767_v33 = vmul.f32 %v3659_v29, %v4792_v19  ;;  %v775_v34 = vmul.f32 %v3667_v30, %v4792_v19  ;;  %v697_v35 = vpop.f32.mrb[3].mxu0  ;;  %v729_v36 = vpop.f32.mrb[3].mxu1 }
 0x1a0   : > { %v787_v37 = vadd.f32 %v4797_v21, %v764_v27  ;;  %v795_v38 = vadd.f32 %v4797_v21, %v772_v28  ;;  %v765_v39 = vmul.f32 %v4792_v19, %v697_v35  ;;  %v773_v40 = vmul.f32 %v4792_v19, %v729_v36  ;;  %v1072_v27 = vld [vmem:[#allocation2 + $0x48] sm:$0xf]  ;;  %v1034_v36 = vld [vmem:[#allocation2 + $0xc] sm:$0xf] }
 0x1a1   : > { %v805_v41 = vmax.f32 %v789_v31, 0.0  ;;  %v813_v42 = vmax.f32 %v797_v32, 0.0  ;;  %v790_v43 = vadd.f32 %v4797_v21, %v767_v33  ;;  %v798_v44 = vadd.f32 %v4797_v21, %v775_v34 }
 0x1a2   : > { %v803_v45 = vmax.f32 %v787_v37, 0.0  ;;  %v811_v46 = vmax.f32 %v795_v38, 0.0  ;;  %v788_v47 = vadd.f32 %v4797_v21, %v765_v39  ;;  %v796_v48 = vadd.f32 %v4797_v21, %v773_v40  ;;  %v1065_v37 = vld [vmem:[#allocation2 + $0x3c] sm:$0xf] }
 0x1a3   : > { %v3602_v49 = vpack.c.bf16 %v805_v41, %v805_v41  ;;  %v3610_v50 = vpack.c.bf16 %v813_v42, %v813_v42  ;;  %v806_v51 = vmax.f32 %v790_v43, 0.0  ;;  %v814_v52 = vmax.f32 %v798_v44, 0.0 }
 0x1a4   : > { %v3600_v53 = vpack.c.bf16 %v803_v45, %v803_v45  ;;  %v3608_v54 = vpack.c.bf16 %v811_v46, %v811_v46  ;;  %v804_v55 = vmax.f32 %v788_v47, 0.0  ;;  %v812_v56 = vmax.f32 %v796_v48, 0.0  ;;  %v3662_v57 = vpop.f32.mrb[4].mxu0  ;;  %v3670_v58 = vpop.f32.mrb[4].mxu1 }
 0x1a5   : > { %v888_v59 = vshrl.u32 %v3602_v49, 16  ;;  %v891_v60 = vshll.u32 %v3602_v49, 16  ;;  %v956_v61 = vshrl.u32 %v3610_v50, 16  ;;  %v959_v62 = vshll.u32 %v3610_v50, 16  ;;  %v4815_v63 = vpop.f32.mrb[5].mxu0  ;;  %v4817_v0 = vpop.f32.mrb[5].mxu1 }
 0x1a6   : > { %v871_v10 = vshrl.u32 %v3600_v53, 16  ;;  %v874_v11 = vshll.u32 %v3600_v53, 16  ;;  %v939_v12 = vshrl.u32 %v3608_v54, 16  ;;  %v942_v14 = vshll.u32 %v3608_v54, 16  ;;  %v4819_v15 = vpop.f32.mrb[6].mxu0  ;;  %v4821_v16 = vpop.f32.mrb[6].mxu1 }
 0x1a7   : > { %v890_v17 = vrot.slane %v888_v59, 7  ;;  %v4823_v18 = vrot.slane %v956_v61, 7  ;;  %v3603_v20 = vpack.c.bf16 %v806_v51, %v806_v51  ;;  %v3611_v22 = vpack.c.bf16 %v814_v52, %v814_v52  ;;  %v4825_v23 = vpop.f32.mrb[7].mxu0  ;;  %v4827_v24 = vpop.f32.mrb[7].mxu1 }
 0x1a8   : > { %v4835_v28 = vrot.slane %v871_v10, 7  ;;  %v4837_v29 = vrot.slane %v939_v12, 7  ;;  %v3601_v30 = vpack.c.bf16 %v804_v55, %v804_v55  ;;  %v3609_v31 = vpack.c.bf16 %v812_v56, %v812_v56  ;;  %v1048_v55 = vld [vmem:[#allocation2 + $0x20] sm:$0x1] }
 0x1a9   : > { %v893_v32 = vor.u32 %v891_v60, %v890_v17  ;;  %v894_v33 = vrot.slane %v890_v17, 4  ;;  %v961_v34 = vor.u32 %v959_v62, %v4823_v18  ;;  %v962_v35 = vrot.slane %v4823_v18, 4 }
 0x1aa   : > { %v876_v38 = vor.u32 %v874_v11, %v4835_v28  ;;  %v877_v39 = vrot.slane %v4835_v28, 4  ;;  %v944_v40 = vor.u32 %v942_v14, %v4837_v29  ;;  %v945_v41 = vrot.slane %v4837_v29, 4  ;;  %v1076_v11 = vld [vmem:[#allocation2 + $0x50] sm:$0x1]  ;;  %v1069_v29 = vld [vmem:[#allocation2 + $0x44] sm:$0x1] }
 0x1ab   : > { %v1045_v42 = vsel %vm4831_vm8, %v893_v32, %v1044_v26  ;;  %v1073_v43 = vsel %vm4831_vm8, %v961_v34, %v1072_v27  ;;  %v896_v44 = vshrl.u32 %v3603_v20, 16  ;;  %v899_v45 = vshll.u32 %v3603_v20, 16  ;;  %v1041_v20 = vld [vmem:[#allocation2 + $0x14] sm:$0x1] }
 0x1ac   : > { %1046 = vst [vmem:[#allocation2 + $0x18] sm:$0xf] %v1045_v42  ;;  %1074 = vst [vmem:[#allocation2 + $0x48] sm:$0xf] %v1073_v43  ;;  %v1035_v46 = vsel %vm4831_vm8, %v876_v38, %v1034_v36  ;;  %v1066_v47 = vsel %vm4831_vm8, %v944_v40, %v1065_v37  ;;  %v964_v48 = vshrl.u32 %v3611_v22, 16  ;;  %v967_v49 = vshll.u32 %v3611_v22, 16 }
 0x1ad   : > { %1036 = vst [vmem:[#allocation2 + $0xc] sm:$0xf] %v1035_v46  ;;  %1067 = vst [vmem:[#allocation2 + $0x3c] sm:$0xf] %v1066_v47  ;;  %v898_v50 = vrot.slane %v896_v44, 7  ;;  %v879_v51 = vshrl.u32 %v3601_v30, 16  ;;  %v770_v60 = vmul.f32 %v3662_v57, %v4792_v19  ;;  %v778_v61 = vmul.f32 %v3670_v58, %v4792_v19 }
 0x1ae   : > { %v882_v52 = vshll.u32 %v3601_v30, 16  ;;  %v947_v53 = vshrl.u32 %v3609_v31, 16  ;;  %v966_v56 = vrot.slane %v964_v48, 7  ;;  %v950_v59 = vshll.u32 %v3609_v31, 16 }
 0x1af   : > { %v901_v62 = vor.u32 %v899_v45, %v898_v50  ;;  %v903_v10 = vrot.slane %v898_v50, 4  ;;  %v881_v12 = vrot.slane %v879_v51, 7  ;;  %v793_v22 = vadd.f32 %v4797_v21, %v770_v60  ;;  %v1058_v60 = vld [vmem:[#allocation2 + $0x30] sm:$0xf] }
 0x1b0   : > { %v949_v14 = vrot.slane %v947_v53, 7  ;;  %v969_v17 = vor.u32 %v967_v49, %v966_v56  ;;  %v971_v18 = vrot.slane %v966_v56, 4  ;;  %v801_v26 = vadd.f32 %v4797_v21, %v778_v61  ;;  %v1086_v61 = vld [vmem:[#allocation2 + $0x60] sm:$0xf] }
 0x1b1   : > { %v902_v27 = vsel %vm4855_vm9, %v894_v33, %v901_v62  ;;  %v1049_v57 = vsel %vm4771_vm3, %v903_v10, %v1048_v55  ;;  %v884_v28 = vor.u32 %v882_v52, %v881_v12  ;;  %v886_v58 = vrot.slane %v881_v12, 4 }
 0x1b2   : > { %1047 = vst.msk [vmem:[#allocation2 + $0x1c] sm:$0xf] %vm1031_vm6, %v902_v27  ;;  %1050 = vst [vmem:[#allocation2 + $0x20] sm:$0x1] %v1049_v57  ;;  %v970_v30 = vsel %vm4855_vm9, %v962_v35, %v969_v17  ;;  %v1077_v31 = vsel %vm4771_vm3, %v971_v18, %v1076_v11  ;;  %v952_v32 = vor.u32 %v950_v59, %v949_v14  ;;  %v954_v34 = vrot.slane %v949_v14, 4 }
 0x1b3   : > { %v1099_v36 = vld [vmem:[#allocation2 + $0x18] sm:$0x1]  ;;  %v1111_v37 = vld [vmem:[#allocation2 + $0x48] sm:$0x1]  ;;  %1075 = vst.msk [vmem:[#allocation2 + $0x4c] sm:$0xf] %vm1031_vm6, %v970_v30  ;;  %v885_v33 = vsel %vm4855_vm9, %v877_v39, %v884_v28  ;;  %v1042_v38 = vsel %vm4771_vm3, %v886_v58, %v1041_v20  ;;  %v776_v51 = vmul.f32 %v4792_v19, %v4817_v0  ;;  %v771_v52 = vmul.f32 %v4819_v15, %v4792_v19 }
 0x1b4   : > { %1078 = vst [vmem:[#allocation2 + $0x50] sm:$0x1] %v1077_v31  ;;  %v809_v40 = vmax.f32 %v793_v22, 0.0  ;;  %v817_v42 = vmax.f32 %v801_v26, 0.0  ;;  %v1100_v35 = vsel %vm4771_vm3, 0, %v1099_v36  ;;  %v1112_v43 = vsel %vm4771_vm3, 0, %v1111_v37 }
 0x1b5   : > { %v1096_v44 = vld [vmem:[#allocation2 + $0xc] sm:$0x1]  ;;  %v1108_v45 = vld [vmem:[#allocation2 + $0x3c] sm:$0x1]  ;;  %1038 = vst.msk [vmem:[#allocation2 + $0x10] sm:$0xf] %vm1031_vm6, %v885_v33  ;;  %v953_v46 = vsel %vm4855_vm9, %v945_v41, %v952_v32  ;;  %v1070_v39 = vsel %vm4771_vm3, %v954_v34, %v1069_v29  ;;  %v768_v41 = vmul.f32 %v4792_v19, %v4815_v63  ;;  %v779_v53 = vmul.f32 %v4821_v16, %v4792_v19 }
 0x1b6   : > { %1043 = vst [vmem:[#allocation2 + $0x14] sm:$0x1] %v1042_v38  ;;  %1101 = vst [vmem:[#allocation2 + $0x18] sm:$0x1] %v1100_v35  ;;  %v1097_v47 = vsel %vm4771_vm3, 0, %v1096_v44  ;;  %v1109_v48 = vsel %vm4771_vm3, 0, %v1108_v45  ;;  %v3606_v49 = vpack.c.bf16 %v809_v40, %v809_v40  ;;  %v3614_v50 = vpack.c.bf16 %v817_v42, %v817_v42 }
 0x1b7   : > { %1113 = vst [vmem:[#allocation2 + $0x48] sm:$0x1] %v1112_v43  ;;  %1068 = vst.msk [vmem:[#allocation2 + $0x40] sm:$0xf] %vm1031_vm6, %v953_v46  ;;  %v791_v62 = vadd.f32 %v4797_v21, %v768_v41  ;;  %v799_v10 = vadd.f32 %v4797_v21, %v776_v51  ;;  %v794_v63 = vadd.f32 %v4797_v21, %v771_v52  ;;  %v1051_v44 = vld [vmem:[#allocation2 + $0x24] sm:$0xf] }
 0x1b8   : > { %1071 = vst [vmem:[#allocation2 + $0x44] sm:$0x1] %v1070_v39  ;;  %1098 = vst [vmem:[#allocation2 + $0xc] sm:$0x1] %v1097_v47  ;;  %v922_v55 = vshrl.u32 %v3606_v49, 16  ;;  %v990_v56 = vshrl.u32 %v3614_v50, 16  ;;  %v802_v15 = vadd.f32 %v4797_v21, %v779_v53  ;;  %v769_v58 = vmul.f32 %v4792_v19, %v4825_v23 }
 0x1b9   : > { %1110 = vst [vmem:[#allocation2 + $0x3c] sm:$0x1] %v1109_v48  ;;  %v925_v59 = vshll.u32 %v3606_v49, 16  ;;  %v1130_v11 = vld [vmem:[#allocation2 + $0x20] sm:$0x1]  ;;  %v993_v14 = vshll.u32 %v3614_v50, 16  ;;  %v777_v34 = vmul.f32 %v4792_v19, %v4827_v24 }
 0x1ba   : > { %v924_v12 = vrot.slane %v922_v55, 7  ;;  %v4902_v0 = vrot.slane %v990_v56, 7  ;;  %v1131_v16 = vsel %vm4779_vm5, 0, %v1130_v11  ;;  %v807_v18 = vmax.f32 %v791_v62, 0.0  ;;  %v1079_v47 = vld [vmem:[#allocation2 + $0x54] sm:$0xf] }
 0x1bb   : > { %v1142_v17 = vld [vmem:[#allocation2 + $0x50] sm:$0x1]  ;;  %v815_v20 = vmax.f32 %v799_v10, 0.0  ;;  %v810_v22 = vmax.f32 %v794_v63, 0.0  ;;  %1132 = vst [vmem:[#allocation2 + $0x20] sm:$0x1] %v1131_v16  ;;  %v792_v19 = vadd.f32 %v4797_v21, %v769_v58  ;;  %v800_v39 = vadd.f32 %v4797_v21, %v777_v34 }
 0x1bc   : > { %v1143_v26 = vsel %vm4779_vm5, 0, %v1142_v17  ;;  %v927_v57 = vor.u32 %v925_v59, %v924_v12  ;;  %v995_v28 = vor.u32 %v993_v14, %v4902_v0  ;;  %v3604_v31 = vpack.c.bf16 %v807_v18, %v807_v18  ;;  %v1062_v53 = vld [vmem:[#allocation2 + $0x38] sm:$0x1] }
 0x1bd   : > { %v1127_v27 = vld [vmem:[#allocation2 + $0x14] sm:$0x1]  ;;  %1144 = vst [vmem:[#allocation2 + $0x50] sm:$0x1] %v1143_v26  ;;  %v3612_v32 = vpack.c.bf16 %v815_v20, %v815_v20  ;;  %v3607_v33 = vpack.c.bf16 %v810_v22, %v810_v22  ;;  %v818_v43 = vmax.f32 %v802_v15, 0.0  ;;  %v808_v41 = vmax.f32 %v792_v19, 0.0 }
 0x1be   : > { %v1128_v29 = vsel %vm4779_vm5, 0, %v1127_v27  ;;  %v1059_v37 = vsel %vm4831_vm8, %v927_v57, %v1058_v60  ;;  %v1087_v23 = vsel %vm4831_vm8, %v995_v28, %v1086_v61  ;;  %v905_v38 = vshrl.u32 %v3604_v31, 16  ;;  %v1090_v20 = vld [vmem:[#allocation2 + $0x68] sm:$0x1] }
 0x1bf   : > { %v1139_v30 = vld [vmem:[#allocation2 + $0x44] sm:$0x1]  ;;  %1129 = vst [vmem:[#allocation2 + $0x14] sm:$0x1] %v1128_v29  ;;  %1060 = vst [vmem:[#allocation2 + $0x30] sm:$0xf] %v1059_v37  ;;  %v3615_v50 = vpack.c.bf16 %v818_v43, %v818_v43  ;;  %v3605_v21 = vpack.c.bf16 %v808_v41, %v808_v41 }
 0x1c0   : > { %v1140_v36 = vsel %vm4779_vm5, 0, %v1139_v30  ;;  %1088 = vst [vmem:[#allocation2 + $0x60] sm:$0xf] %v1087_v23  ;;  %v973_v40 = vshrl.u32 %v3612_v32, 16  ;;  %v908_v42 = vshll.u32 %v3604_v31, 16  ;;  %v930_v35 = vshrl.u32 %v3607_v33, 16 }
 0x1c1   : > { %1141 = vst [vmem:[#allocation2 + $0x44] sm:$0x1] %v1140_v36  ;;  %v907_v24 = vrot.slane %v905_v38, 7  ;;  %v976_v46 = vshll.u32 %v3612_v32, 16  ;;  %v933_v49 = vshll.u32 %v3607_v33, 16  ;;  %v928_v55 = vrot.slane %v924_v12, 4 }
 0x1c2   : > { %v4923_v45 = vrot.slane %v973_v40, 7  ;;  %v932_v48 = vrot.slane %v930_v35, 7  ;;  %v998_v60 = vshrl.u32 %v3615_v50, 16  ;;  %v816_v10 = vmax.f32 %v800_v39, 0.0  ;;  %v1055_v32 = vld [vmem:[#allocation2 + $0x2c] sm:$0x1] }
 0x1c3   : > { %v910_v51 = vor.u32 %v908_v42, %v907_v24  ;;  %v1001_v16 = vshll.u32 %v3615_v50, 16  ;;  %v913_v22 = vshrl.u32 %v3605_v21, 16  ;;  %v996_v26 = vrot.slane %v4902_v0, 4  ;;  %v1083_v38 = vld [vmem:[#allocation2 + $0x5c] sm:$0x1] }
 0x1c4   : > { %v978_v52 = vor.u32 %v976_v46, %v4923_v45  ;;  %v935_v56 = vor.u32 %v933_v49, %v932_v48  ;;  %v937_v59 = vrot.slane %v932_v48, 4  ;;  %v1000_v15 = vrot.slane %v998_v60, 7  ;;  %v3899_v60 = vld [vmem:[%s500_s19] sm:$0xff] (!%p3425_p3)  }
 0x1c5   : > { %v1052_v61 = vsel %vm4831_vm8, %v910_v51, %v1051_v44  ;;  %v3613_v28 = vpack.c.bf16 %v816_v10, %v816_v10  ;;  %v915_v58 = vrot.slane %v913_v22, 7  ;;  %v916_v29 = vshll.u32 %v3605_v21, 16 }
 0x1c6   : > { %v1080_v62 = vsel %vm4831_vm8, %v978_v52, %v1079_v47  ;;  %v1105_v63 = vld [vmem:[#allocation2 + $0x30] sm:$0x1]  ;;  %1053 = vst [vmem:[#allocation2 + $0x24] sm:$0xf] %v1052_v61  ;;  %v936_v14 = vsel %vm4855_vm9, %v928_v55, %v935_v56  ;;  %v1063_v12 = vsel %vm4771_vm3, %v937_v59, %v1062_v53  ;;  %v1003_v27 = vor.u32 %v1001_v16, %v1000_v15  ;;  %v3898_v56 = vld [vmem:[%s5563_s25] sm:$0xff] (!%p3425_p3)  }
 0x1c7   : > { %v1117_v11 = vld [vmem:[#allocation2 + $0x60] sm:$0x1]  ;;  %1081 = vst [vmem:[#allocation2 + $0x54] sm:$0xf] %v1080_v62  ;;  %v1106_v17 = vsel %vm4771_vm3, 0, %v1105_v63  ;;  %v1005_v57 = vrot.slane %v1000_v15, 4  ;;  %v918_v37 = vor.u32 %v916_v29, %v915_v58 }
 0x1c8   : > { %v1118_v18 = vsel %vm4771_vm3, 0, %v1117_v11  ;;  %1061 = vst.msk [vmem:[#allocation2 + $0x34] sm:$0xf] %vm1031_vm6, %v936_v14  ;;  %1064 = vst [vmem:[#allocation2 + $0x38] sm:$0x1] %v1063_v12  ;;  %v1004_v30 = vsel %vm4855_vm9, %v996_v26, %v1003_v27  ;;  %v981_v34 = vshrl.u32 %v3613_v28, 16 }
 0x1c9   : > { %1107 = vst [vmem:[#allocation2 + $0x30] sm:$0x1] %v1106_v17  ;;  %1119 = vst [vmem:[#allocation2 + $0x60] sm:$0x1] %v1118_v18  ;;  %v1091_v31 = vsel %vm4771_vm3, %v1005_v57, %v1090_v20  ;;  %v911_v36 = vrot.slane %v907_v24, 4  ;;  %v920_v0 = vrot.slane %v915_v58, 4 }
 0x1ca   : > { %1089 = vst.msk [vmem:[#allocation2 + $0x64] sm:$0xf] %vm1031_vm6, %v1004_v30  ;;  %1092 = vst [vmem:[#allocation2 + $0x68] sm:$0x1] %v1091_v31  ;;  %v983_v23 = vrot.slane %v981_v34, 7  ;;  %v984_v33 = vshll.u32 %v3613_v28, 16 }
 0x1cb   : > { %v979_v42 = vrot.slane %v4923_v45, 4  ;;  %v919_v43 = vsel %vm4855_vm9, %v911_v36, %v918_v37  ;;  %v1056_v19 = vsel %vm4771_vm3, %v920_v0, %v1055_v32  ;;  %v4276_v59 = vmov (!%p3425_p3), 0.0   ;;  %v3430_v62 = vld [vmem:[%s5565_s5] ss:$0 sm:$0xff] (!%p3425_p3)  ;;  %v1267_v31 = vld [vmem:[#allocation2 + $0x8] sm:$0x1] (!%p3425_p3) }
 0x1cc   : > { %1054 = vst.msk [vmem:[#allocation2 + $0x28] sm:$0xf] %vm1031_vm6, %v919_v43  ;;  %1057 = vst [vmem:[#allocation2 + $0x2c] sm:$0x1] %v1056_v19  ;;  %v986_v39 = vor.u32 %v984_v33, %v983_v23  ;;  %v988_v47 = vrot.slane %v983_v23, 4  ;;  %3672 = vmatprep.subr.bf16.mxu0 (!%p3425_p3), %v4276_v59  ;;  %3674 = vmatprep.mubr.msk.bf16.mxu0 (!%p3425_p3), %vm4277_vm10, %v4276_v59 }
 0x1cd   : > { %v1102_v40 = vld [vmem:[#allocation2 + $0x24] sm:$0x1]  ;;  %3673 = vmatpush3.bf16.msra.mxu0 (!%p3425_p3), %v3898_v56  ;;  %v1263_v28 = vld [vmem:[#allocation2] sm:$0xf] (!%p3425_p3) }
 0x1ce   : > { %v1114_v35 = vld [vmem:[#allocation2 + $0x54] sm:$0x1]  ;;  %v1103_v24 = vsel %vm4771_vm3, 0, %v1102_v40  ;;  %v987_v48 = vsel %vm4855_vm9, %v979_v42, %v986_v39  ;;  %v1084_v49 = vsel %vm4771_vm3, %v988_v47, %v1083_v38 }
 0x1cf   : > { %v1115_v44 = vsel %vm4771_vm3, 0, %v1114_v35  ;;  %v1136_v46 = vld [vmem:[#allocation2 + $0x38] sm:$0x1]  ;;  %1104 = vst [vmem:[#allocation2 + $0x24] sm:$0x1] %v1103_v24 }
 0x1d0   : > { %1116 = vst [vmem:[#allocation2 + $0x54] sm:$0x1] %v1115_v44  ;;  %v1137_v45 = vsel %vm4779_vm5, 0, %v1136_v46  ;;  %1082 = vst.msk [vmem:[#allocation2 + $0x58] sm:$0xf] %vm1031_vm6, %v987_v48  ;;  %3675 = vmatmul.mubr.msk.bf16.vlgmr.msra.gmra.mrb[0].mxu0 (!%p3425_p3), %vm635_vm0, %v3899_v60 }
 0x1d1   : > { %1138 = vst [vmem:[#allocation2 + $0x38] sm:$0x1] %v1137_v45  ;;  %1085 = vst [vmem:[#allocation2 + $0x5c] sm:$0x1] %v1084_v49  ;;  %v1148_v50 = vld [vmem:[#allocation2 + $0x68] sm:$0x1] }
 0x1d2   : > { %v1149_v41 = vsel %vm4779_vm5, 0, %v1148_v50 }
 0x1d3   : > { %1150 = vst [vmem:[#allocation2 + $0x68] sm:$0x1] %v1149_v41  ;;  %v1133_v51 = vld [vmem:[#allocation2 + $0x2c] sm:$0x1] }
 0x1d4   : > { %v1134_v52 = vsel %vm4779_vm5, 0, %v1133_v51  ;;  %1157 = sbr.rel (%p3425_p3) target bundleno = 694 (0x2b6), region = 84 }
 0x1d5   : > { %1135 = vst [vmem:[#allocation2 + $0x2c] sm:$0x1] %v1134_v52 }
 0x1d8   : > { %v1145_v53 = vld [vmem:[#allocation2 + $0x5c] sm:$0x1] }
 0x1d9   : > { %v1146_v55 = vsel %vm4779_vm5, 0, %v1145_v53 }
 0x1da   : > { %1147 = vst [vmem:[#allocation2 + $0x5c] sm:$0x1] %v1146_v55 }
 0x2a3   : > { %v1210_v61 = vpop.f32.mrb[0].mxu0 }
 0x2a4   : > { %v1224_v21 = vmul.f32 %v3429_v13, %v1210_v61  ;;  %v3676_v10 = vpop.f32.mrb[1].mxu0 }
 0x2a5   : > { %v1213_v63 = vpop.f32.mrb[2].mxu0 }
 0x2a6   : > { %v1233_v11 = vadd.f32 %v3430_v62, %v1224_v21  ;;  %v1225_v14 = vmul.f32 %v3429_v13, %v1213_v63  ;;  %v3677_v12 = vpop.f32.mrb[3].mxu0 }
 0x2a8   : > { %v1235_v15 = vmax.f32 %v1233_v11, 0.0  ;;  %v1234_v16 = vadd.f32 %v3430_v62, %v1225_v14 }
 0x2aa   : > { %v3616_v17 = vpack.c.bf16 %v1235_v15, %v1235_v15  ;;  %v1236_v18 = vmax.f32 %v1234_v16, 0.0 }
 0x2ac   : > { %v1244_v20 = vshrl.u32 %v3616_v17, 16  ;;  %v3617_v22 = vpack.c.bf16 %v1236_v18, %v1236_v18  ;;  %v1247_v27 = vshll.u32 %v3616_v17, 16 }
 0x2ae   : > { %v1246_v26 = vrot.slane %v1244_v20, 7  ;;  %v1252_v57 = vshrl.u32 %v3617_v22, 16  ;;  %v1255_v30 = vshll.u32 %v3617_v22, 16 }
 0x2b0   : > { %v1249_v58 = vor.u32 %v1247_v27, %v1246_v26  ;;  %v1254_v29 = vrot.slane %v1252_v57, 7  ;;  %v1250_v32 = vrot.slane %v1246_v26, 4 }
 0x2b2   : > { %v1264_v34 = vsel %vm4831_vm8, %v1249_v58, %v1263_v28  ;;  %v1257_v36 = vor.u32 %v1255_v30, %v1254_v29  ;;  %v1259_v37 = vrot.slane %v1254_v29, 4 }
 0x2b3   : > { %1265 = vst [vmem:[#allocation2] sm:$0xf] %v1264_v34 }
 0x2b4   : > { %v1258_v0 = vsel %vm4855_vm9, %v1250_v32, %v1257_v36  ;;  %v1268_v23 = vsel %vm4771_vm3, %v1259_v37, %v1267_v31 }
 0x2b5   : > { %1266 = vst.msk [vmem:[#allocation2 + $0x4] sm:$0xf] %vm1031_vm6, %v1258_v0  ;;  %1269 = vst [vmem:[#allocation2 + $0x8] sm:$0x1] %v1268_v23 }
 0x2b6 PF: > { %s5566_s11 = sld [smem:[#allocation17_spill]] }
 0x2bc   : > { %p3433_p9 = scmp.ne.s32.totalorder %s5566_s11, 0 }
 0x2bd   : > { %v4278_v33 = vmov (!%p3433_p9), 0  }
 0x2be   : > { %1273 = sbr.rel (%p3433_p9) target bundleno = 709 (0x2c5), region = 88  ;;  %1274 = vst.msk [vmem:[#allocation2] sm:$0xf] (!%p3433_p9), %vm1031_vm6, %v4278_v33  ;;  %1275 = vst.msk [vmem:[#allocation2 + $0x4] sm:$0xf] (!%p3433_p9), %vm1031_vm6, %v4278_v33 }
 0x2bf   : > { %1277 = vst.msk [vmem:[#allocation2 + $0x8] sm:$0x1] (!%p3433_p9), %vm1039_vm2, %v4278_v33 }
 0x2c5 PF: > { %s5567_s19 = sld [smem:[#allocation17_spill]] }
 0x2cb   : > { %p3434_p7 = scmp.ge.s32.totalorder %s5567_s19, 1 }
 0x2cc   : > { %s5568_s12 = sld [smem:[#allocation30_spill]] (!%p3434_p7)  ;;  %v4279_v40 = vmov (!%p3434_p7), 0.0   ;;  %v3901_v42 = vld [vmem:[%s509_s13] sm:$0xff] (!%p3434_p7)   ;;  %vm4280_vm11 = vmmov (!%p3434_p7), 0   ;;  %s5569_s8 = sld [smem:[#allocation31_spill]] (!%p3434_p7) }
 0x2cd   : > { %1281 = sbr.rel (%p3434_p7) target bundleno = 956 (0x3bc), region = 92  ;;  %3678 = vmatprep.subr.bf16.mxu0 (!%p3434_p7), %v4279_v40  ;;  %3680 = vmatprep.mubr.msk.bf16.mxu0 (!%p3434_p7), %vm4280_vm11, %v4279_v40  ;;  %s5570_s25 = sld [smem:[#allocation32_spill]] (!%p3434_p7)  ;;  %v1388_v59 = vld [vmem:[#allocation2 + $0x6c] sm:$0xf] (!%p3434_p7)  ;;  %v1392_v62 = vld [vmem:[#allocation2 + $0x74] sm:$0x1] (!%p3434_p7) }
 0x2d2   : > { %v3900_v38 = vld [vmem:[%s5568_s12] sm:$0xff] (!%p3434_p7)  }
 0x2d3   : > { %3679 = vmatpush3.bf16.msra.mxu0 (!%p3434_p7), %v3900_v38  ;;  %v3438_v35 = vld [vmem:[%s5569_s8] ss:$0 sm:$0xff] (!%p3434_p7) }
 0x2d4   : > { %v3439_v19 = vld [vmem:[%s5570_s25] ss:$0 sm:$0xff] }
 0x2d6   : > { %3681 = vmatmul.mubr.msk.bf16.vlgmr.msra.gmra.mrb[0].mxu0 %vm635_vm0, %v3901_v42 }
 0x3a9   : > { %v1334_v43 = vpop.f32.mrb[0].mxu0 }
 0x3aa   : > { %v1348_v24 = vmul.f32 %v3438_v35, %v1334_v43  ;;  %v3682_v44 = vpop.f32.mrb[1].mxu0 }
 0x3ab   : > { %v1337_v46 = vpop.f32.mrb[2].mxu0 }
 0x3ac   : > { %v1357_v39 = vadd.f32 %v3439_v19, %v1348_v24  ;;  %v1349_v47 = vmul.f32 %v3438_v35, %v1337_v46  ;;  %v3683_v45 = vpop.f32.mrb[3].mxu0 }
 0x3ae   : > { %v1359_v48 = vmax.f32 %v1357_v39, 0.0  ;;  %v1358_v49 = vadd.f32 %v3439_v19, %v1349_v47 }
 0x3b0   : > { %v3618_v50 = vpack.c.bf16 %v1359_v48, %v1359_v48  ;;  %v1360_v41 = vmax.f32 %v1358_v49, 0.0 }
 0x3b2   : > { %v1368_v51 = vshrl.u32 %v3618_v50, 16  ;;  %v3619_v52 = vpack.c.bf16 %v1360_v41, %v1360_v41  ;;  %v1371_v55 = vshll.u32 %v3618_v50, 16 }
 0x3b4   : > { %v1370_v53 = vrot.slane %v1368_v51, 7  ;;  %v1376_v56 = vshrl.u32 %v3619_v52, 16  ;;  %v1379_v61 = vshll.u32 %v3619_v52, 16 }
 0x3b6   : > { %v1373_v60 = vor.u32 %v1371_v55, %v1370_v53  ;;  %v1378_v13 = vrot.slane %v1376_v56, 7  ;;  %v1374_v21 = vrot.slane %v1370_v53, 4 }
 0x3b8   : > { %v1389_v10 = vsel %vm4831_vm8, %v1373_v60, %v1388_v59  ;;  %v1381_v63 = vor.u32 %v1379_v61, %v1378_v13  ;;  %v1383_v11 = vrot.slane %v1378_v13, 4 }
 0x3b9   : > { %1390 = vst [vmem:[#allocation2 + $0x6c] sm:$0xf] %v1389_v10 }
 0x3ba   : > { %v1382_v14 = vsel %vm4855_vm9, %v1374_v21, %v1381_v63  ;;  %v1393_v12 = vsel %vm4771_vm3, %v1383_v11, %v1392_v62 }
 0x3bb   : > { %1391 = vst.msk [vmem:[#allocation2 + $0x70] sm:$0xf] %vm1031_vm6, %v1382_v14  ;;  %1394 = vst [vmem:[#allocation2 + $0x74] sm:$0x1] %v1393_v12 }
 0x3bc PF: > { %s5571_s9 = sld [smem:[#allocation17_spill]] }
 0x3c2   : > { %p3442_p6 = scmp.ne.s32.totalorder %s5571_s9, 1 }
 0x3c3   : > { %v4281_v15 = vmov (!%p3442_p6), 0  }
 0x3c4   : > { %1398 = sbr.rel (%p3442_p6) target bundleno = 971 (0x3cb), region = 96  ;;  %1400 = vst.msk [vmem:[#allocation2 + $0x6c] sm:$0xf] (!%p3442_p6), %vm1031_vm6, %v4281_v15  ;;  %1401 = vst.msk [vmem:[#allocation2 + $0x70] sm:$0xf] (!%p3442_p6), %vm1031_vm6, %v4281_v15 }
 0x3c5   : > { %1403 = vst.msk [vmem:[#allocation2 + $0x74] sm:$0x1] (!%p3442_p6), %vm1039_vm2, %v4281_v15 }
 0x3cb PF: > { %v3902_v25 = vld [vmem:[#allocation2 + $0xc] sm:$0xff]   ;;  %s4282_s13 = smov 12   ;;  %v3903_v9 = vld [vmem:[#allocation2] sm:$0xfe]   ;;  %vm1783_vm12 = vcmask 1046528   ;;  %s4283_s4 = smov 8  }
 0x3cc   : > { %1897 = vrot.lane.b32.xlu0 %v3902_v25, %s4282_s13  ;;  %v3904_v54 = vld [vmem:[#allocation2 + $0x8] ss:$0 sps:$4 sm:$0x11]   ;;  %v3905_v16 = vld [vmem:[#allocation2] sm:$0xff]   ;;  %v1784_v17 = vrot.slane %v3903_v9, 1  ;;  %v3909_v30 = vld [vmem:[#allocation2 + $0xc] sm:$0xff]  }
 0x3cd   : > { %v1785_v18 = vrot.slane %v3904_v54, 1  ;;  %vm1565_vm13 = vsmask.f32 7424  ;;  %v3906_v20 = vld [vmem:[#allocation2 + $0x8] ss:$0 sps:$4 sm:$0x11]  }
 0x3ce   : > { %v1567_v22 = vshrl.u32 %v3905_v16, 16  ;;  %v1569_v26 = vshll.u32 %v3905_v16, 16  ;;  %v1574_v28 = vshll.u32 %v3906_v20, 16  ;;  %v3907_v58 = vld [vmem:[#allocation2 + $0xc] sm:$0xfe]   ;;  %v1579_v0 = vshrl.u32 %v3909_v30, 16 }
 0x3cf   : > { %v1786_v27 = vsel %vm1783_vm12, %v1784_v17, %v1785_v18  ;;  %v3908_v29 = vld [vmem:[#allocation2 + $0x14] ss:$0 sps:$4 sm:$0x11]   ;;  %v1787_v34 = vrot.slane %v3907_v58, 1  ;;  %v1581_v23 = vshll.u32 %v3909_v30, 16  ;;  %v3911_v38 = vld [vmem:[#allocation2 + $0x18] sm:$0xff]  }
 0x3d0   : > { %1808 = vrot.lane.b32.xlu1 %v1786_v27, %s4283_s4  ;;  %v1571_v57 = vrot.slane %v1569_v26, 1  ;;  %v1576_v32 = vrot.slane %v1574_v28, 1  ;;  %v1788_v36 = vrot.slane %v3908_v29, 1  ;;  %v3910_v37 = vld [vmem:[#allocation2 + $0x14] ss:$0 sps:$4 sm:$0x11]  }
 0x3d1   : > { %s4284_s17 = smov 4   ;;  %v1583_v42 = vrot.slane %v1581_v23, 1  ;;  %v1586_v35 = vshll.u32 %v3910_v37, 16  ;;  %v3912_v43 = vld [vmem:[#allocation2 + $0xc] sm:$0xff]   ;;  %v3914_v46 = vld [vmem:[#allocation2 + $0x18] sm:$0xff]   ;;  %s4285_s24 = smov 16  }
 0x3d2   : > { %v1572_v31 = vor.u32 %v1571_v57, %v1567_v22  ;;  %v1789_v40 = vsel %vm1783_vm12, %v1787_v34, %v1788_v36  ;;  %v3913_v19 = vld [vmem:[#allocation2 + $0x14] ss:$0 sps:$4 sm:$0x11]   ;;  %v2019_v39 = vshrl.u32 %v3912_v43, 16  ;;  %v2021_v47 = vshll.u32 %v3912_v43, 16  ;;  %v3922_v9 = vld [vmem:[#allocation2 + $0x18] sm:$0xff]  }
 0x3d3   : > { %v1584_v24 = vor.u32 %v1583_v42, %v1579_v0  ;;  %v1588_v44 = vrot.slane %v1586_v35, 1  ;;  %v2026_v45 = vshll.u32 %v3913_v19, 16  ;;  %v3915_v48 = vld [vmem:[#allocation2 + $0x20] ss:$0 sps:$4 sm:$0x11]   ;;  %v2031_v50 = vshrl.u32 %v3914_v46, 16 }
 0x3d4   : > { %v1577_v33 = vsel %vm1565_vm13, %v1572_v31, %v1576_v32  ;;  %1810 = vrot.lane.b32.xlu1 %v1789_v40, %s4283_s4  ;;  %v2033_v41 = vshll.u32 %v3914_v46, 16  ;;  %v2023_v51 = vrot.slane %v2021_v47, 1  ;;  %v2038_v53 = vshll.u32 %v3915_v48, 16  ;;  %v3916_v56 = vld [vmem:[#allocation2 + $0xc] sm:$0xfe]   ;;  %v3920_v54 = vld [vmem:[#allocation2 + $0x18] sm:$0xff]  }
 0x3d5   : > { %1662 = vrot.lane.b32.xlu0 %v1577_v33, %s4284_s17  ;;  %v1589_v49 = vsel %vm1565_vm13, %v1584_v24, %v1588_v44  ;;  %v2028_v52 = vrot.slane %v2026_v45, 1  ;;  %v3917_v59 = vld [vmem:[#allocation2 + $0x14] ss:$0 sps:$4 sm:$0x11]   ;;  %v2235_v62 = vrot.slane %v3916_v56, 1  ;;  %v3924_v16 = vld [vmem:[#allocation2 + $0x24] sm:$0xff]  }
 0x3d6   : > { %v2035_v55 = vrot.slane %v2033_v41, 1  ;;  %v2024_v60 = vor.u32 %v2023_v51, %v2019_v39  ;;  %v2040_v13 = vrot.slane %v2038_v53, 1  ;;  %v2236_v21 = vrot.slane %v3917_v59, 1  ;;  %v3918_v10 = vld [vmem:[#allocation2 + $0x18] sm:$0xfe]   ;;  %v3921_v18 = vld [vmem:[#allocation2 + $0x24] sm:$0xff]  }
 0x3d7   : > { %v3919_v11 = vld [vmem:[#allocation2 + $0x20] ss:$0 sps:$4 sm:$0x11]   ;;  %v2238_v12 = vrot.slane %v3918_v10, 1  ;;  %v2471_v22 = vshrl.u32 %v3922_v9, 16  ;;  %v2473_v26 = vshll.u32 %v3922_v9, 16 }
 0x3d8   : > { %1899 = vrot.lane.b32.xlu1 %v3911_v38, %s4282_s13  ;;  %v2036_v61 = vor.u32 %v2035_v55, %v2031_v50  ;;  %v2029_v63 = vsel %vm1565_vm13, %v2024_v60, %v2028_v52  ;;  %v2237_v15 = vsel %vm1783_vm12, %v2235_v62, %v2236_v21  ;;  %v2239_v25 = vrot.slane %v3919_v11, 1  ;;  %v3923_v20 = vld [vmem:[#allocation2 + $0x20] ss:$0 sps:$4 sm:$0x11]   ;;  %s4286_s15 = smov 20   ;;  %v3928_v30 = vld [vmem:[#allocation2 + $0x18] sm:$0xff]  }
 0x3d9   : > { %1664 = vrot.lane.b32.xlu0 %v1589_v49, %s4284_s17  ;;  %v2475_v27 = vrot.slane %v2473_v26, 1  ;;  %v2478_v57 = vshll.u32 %v3923_v20, 16  ;;  %v3925_v28 = vld [vmem:[#allocation2 + $0x2c] ss:$0 sps:$4 sm:$0x11]   ;;  %v2483_v58 = vshrl.u32 %v3924_v16, 16 }
 0x3da   : > { %v2041_v14 = vsel %vm1565_vm13, %v2036_v61, %v2040_v13  ;;  %v2240_v17 = vsel %vm1783_vm12, %v2238_v12, %v2239_v25  ;;  %v2485_v29 = vshll.u32 %v3924_v16, 16  ;;  %v2490_v34 = vshll.u32 %v3925_v28, 16  ;;  %v3926_v36 = vld [vmem:[#allocation2 + $0x18] sm:$0xfe]   ;;  %s4287_s21 = smov 24   ;;  %s4288_s5 = smov 28  }
 0x3db   : > { %v2476_v31 = vor.u32 %v2475_v27, %v2471_v22  ;;  %v2480_v32 = vrot.slane %v2478_v57, 1  ;;  %v3927_v0 = vld [vmem:[#allocation2 + $0x20] ss:$0 sps:$4 sm:$0x11]   ;;  %v2687_v38 = vrot.slane %v3926_v36, 1  ;;  %v1591_v43 = vshrl.u32 %v3928_v30, 16 }
 0x3dc   : > { %2116 = vrot.lane.b32.xlu1 %v2041_v14, %s4285_s24  ;;  %v2487_v37 = vrot.slane %v2485_v29, 1  ;;  %v2492_v33 = vrot.slane %v2490_v34, 1  ;;  %v2688_v42 = vrot.slane %v3927_v0, 1  ;;  %v3929_v35 = vld [vmem:[#allocation2 + $0x20] ss:$0 sps:$4 sm:$0x11]  }
 0x3dd   : > { %2114 = vrot.lane.b32.xlu0 %v2029_v63, %s4285_s24  ;;  %v2481_v23 = vsel %vm1565_vm13, %v2476_v31, %v2480_v32  ;;  %v1593_v19 = vshll.u32 %v3928_v30, 16  ;;  %v1598_v46 = vshll.u32 %v3929_v35, 16  ;;  %v3930_v39 = vld [vmem:[#allocation2 + $0x24] sm:$0xfe]   ;;  %s4289_s11 = smov 32   ;;  %v3942_v16 = vld [vmem:[#allocation2 + $0x30] sm:$0xff]  }
 0x3de   : > { %v2488_v40 = vor.u32 %v2487_v37, %v2483_v58  ;;  %v2689_v47 = vsel %vm1783_vm12, %v2687_v38, %v2688_v42  ;;  %v3931_v45 = vld [vmem:[#allocation2 + $0x2c] ss:$0 sps:$4 sm:$0x11]   ;;  %v3932_v48 = vld [vmem:[#allocation2 + $0x24] sm:$0xff]   ;;  %v2690_v41 = vrot.slane %v3930_v39, 1  ;;  %v2055_v26 = vshrl.u32 %v3942_v16, 16 }
 0x3df   : > { %v1595_v44 = vrot.slane %v1593_v19, 1  ;;  %v1600_v50 = vrot.slane %v1598_v46, 1  ;;  %v2691_v51 = vrot.slane %v3931_v45, 1  ;;  %v3933_v52 = vld [vmem:[#allocation2 + $0x2c] ss:$0 sps:$4 sm:$0x11]  }
 0x3e0   : > { %2261 = vrot.lane.b32.xlu1 %v2240_v17, %s4286_s15  ;;  %v2493_v24 = vsel %vm1565_vm13, %v2488_v40, %v2492_v33  ;;  %v1603_v53 = vshrl.u32 %v3932_v48, 16  ;;  %v1605_v55 = vshll.u32 %v3932_v48, 16  ;;  %v3934_v59 = vld [vmem:[#allocation2 + $0x18] sm:$0xfe]   ;;  %v1610_v61 = vshll.u32 %v3933_v52, 16  ;;  %v3939_v29 = vld [vmem:[#allocation2 + $0x30] sm:$0xff]  }
 0x3e1   : > { %2259 = vrot.lane.b32.xlu0 %v2237_v15, %s4286_s15  ;;  %v1596_v49 = vor.u32 %v1595_v44, %v1591_v43  ;;  %v2692_v60 = vsel %vm1783_vm12, %v2690_v41, %v2691_v51  ;;  %v3935_v62 = vld [vmem:[#allocation2 + $0x20] ss:$0 sps:$4 sm:$0x11]   ;;  %v1790_v21 = vrot.slane %v3934_v59, 1  ;;  %v3936_v14 = vld [vmem:[#allocation2 + $0x24] sm:$0xfe]  }
 0x3e2   : > { %v1607_v13 = vrot.slane %v1605_v55, 1  ;;  %v1612_v63 = vrot.slane %v1610_v61, 1  ;;  %v1791_v11 = vrot.slane %v3935_v62, 1  ;;  %v3937_v12 = vld [vmem:[#allocation2 + $0x2c] ss:$0 sps:$4 sm:$0x11]  }
 0x3e3   : > { %v1601_v56 = vsel %vm1565_vm13, %v1596_v49, %v1600_v50  ;;  %v3940_v15 = vld [vmem:[#allocation2 + $0x24] sm:$0xff]   ;;  %v1794_v17 = vrot.slane %v3937_v12, 1  ;;  %v3941_v57 = vld [vmem:[#allocation2 + $0x2c] ss:$0 sps:$4 sm:$0x11]   ;;  %v2057_v28 = vshll.u32 %v3942_v16, 16 }
 0x3e4   : > { %2351 = vrot.lane.b32.xlu1 %v3921_v18, %s4287_s21  ;;  %v1608_v10 = vor.u32 %v1607_v13, %v1603_v53  ;;  %v1792_v9 = vsel %vm1783_vm12, %v1790_v21, %v1791_v11  ;;  %v3938_v18 = vld [vmem:[#allocation2 + $0x24] sm:$0xff]   ;;  %v2043_v20 = vshrl.u32 %v3940_v15, 16  ;;  %v2045_v22 = vshll.u32 %v3940_v15, 16  ;;  %v3943_v31 = vld [vmem:[#allocation2 + $0x38] ss:$0 sps:$4 sm:$0x11]  }
 0x3e5   : > { %2349 = vrot.lane.b32.xlu0 %v3920_v54, %s4287_s21  ;;  %v1793_v54 = vrot.slane %v3936_v14, 1  ;;  %v2050_v30 = vshll.u32 %v3941_v57, 16  ;;  %v2059_v32 = vrot.slane %v2057_v28, 1  ;;  %v2062_v0 = vshll.u32 %v3943_v31, 16  ;;  %v3950_v38 = vld [vmem:[#allocation2 + $0x30] sm:$0xff]   ;;  %v3952_v52 = vld [vmem:[#allocation2 + $0x3c] sm:$0xff]  }
 0x3e6   : > { %v1613_v25 = vsel %vm1565_vm13, %v1608_v10, %v1612_v63  ;;  %v2047_v58 = vrot.slane %v2045_v22, 1  ;;  %v3945_v33 = vld [vmem:[#allocation2 + $0x2c] ss:$0 sps:$4 sm:$0x11]   ;;  %v3946_v43 = vld [vmem:[#allocation2 + $0x30] sm:$0xfe]  }
 0x3e7   : > { %v1795_v27 = vsel %vm1783_vm12, %v1793_v54, %v1794_v17  ;;  %v2052_v36 = vrot.slane %v2050_v30, 1  ;;  %v2060_v37 = vor.u32 %v2059_v32, %v2055_v26  ;;  %v2064_v42 = vrot.slane %v2062_v0, 1  ;;  %v3948_v49 = vld [vmem:[#allocation2 + $0x30] sm:$0xff]   ;;  %v3951_v41 = vld [vmem:[#allocation2 + $0x38] ss:$0 sps:$4 sm:$0x11]  }
 0x3e8   : > { %2568 = vrot.lane.b32.xlu1 %v2493_v24, %s4288_s5  ;;  %v2048_v34 = vor.u32 %v2047_v58, %v2043_v20  ;;  %v2242_v19 = vrot.slane %v3945_v33, 1  ;;  %v3947_v24 = vld [vmem:[#allocation2 + $0x38] ss:$0 sps:$4 sm:$0x11]   ;;  %v2244_v46 = vrot.slane %v3946_v43, 1  ;;  %v2495_v39 = vshrl.u32 %v3950_v38, 16 }
 0x3e9   : > { %2566 = vrot.lane.b32.xlu0 %v2481_v23, %s4288_s5  ;;  %v3944_v23 = vld [vmem:[#allocation2 + $0x24] sm:$0xfe]   ;;  %v2065_v44 = vsel %vm1565_vm13, %v2060_v37, %v2064_v42  ;;  %v2245_v45 = vrot.slane %v3947_v24, 1  ;;  %v2497_v48 = vshll.u32 %v3950_v38, 16  ;;  %v3949_v55 = vld [vmem:[#allocation2 + $0x3c] sm:$0xff]   ;;  %v2502_v59 = vshll.u32 %v3951_v41, 16 }
 0x3ea   : > { %v2053_v40 = vsel %vm1565_vm13, %v2048_v34, %v2052_v36  ;;  %v2241_v35 = vrot.slane %v3944_v23, 1  ;;  %v3953_v53 = vld [vmem:[#allocation2 + $0x44] ss:$0 sps:$4 sm:$0x11]   ;;  %v2509_v13 = vshll.u32 %v3952_v52, 16  ;;  %v3956_v62 = vld [vmem:[#allocation2 + $0x30] sm:$0xff]  }
 0x3eb   : > { %v2246_v50 = vsel %vm1783_vm12, %v2244_v46, %v2245_v45  ;;  %v2499_v51 = vrot.slane %v2497_v48, 1  ;;  %v2514_v61 = vshll.u32 %v3953_v53, 16  ;;  %v2504_v21 = vrot.slane %v2502_v59, 1  ;;  %v3954_v10 = vld [vmem:[#allocation2 + $0x30] sm:$0xfe]   ;;  %v3960_v54 = vld [vmem:[#allocation2 + $0x3c] sm:$0xff]  }
 0x3ec   : > { %1666 = vrot.lane.b32.xlu1 %v1601_v56, %s4284_s17  ;;  %v3955_v63 = vld [vmem:[#allocation2 + $0x38] ss:$0 sps:$4 sm:$0x11]   ;;  %v2511_v11 = vrot.slane %v2509_v13, 1  ;;  %v2693_v15 = vrot.slane %v3954_v10, 1  ;;  %v1627_v28 = vshrl.u32 %v3960_v54, 16 }
 0x3ed   : > { %2711 = vrot.lane.b32.xlu0 %v2689_v47, %s4289_s11  ;;  %v2243_v47 = vsel %vm1783_vm12, %v2241_v35, %v2242_v19  ;;  %v2500_v56 = vor.u32 %v2499_v51, %v2495_v39  ;;  %v2516_v14 = vrot.slane %v2514_v61, 1  ;;  %v3957_v17 = vld [vmem:[#allocation2 + $0x38] ss:$0 sps:$4 sm:$0x11]   ;;  %v3958_v20 = vld [vmem:[#allocation2 + $0x3c] sm:$0xfe]  }
 0x3ee   : > { %v3959_v57 = vld [vmem:[#allocation2 + $0x44] ss:$0 sps:$4 sm:$0x11]   ;;  %v1629_v30 = vshll.u32 %v3960_v54, 16  ;;  %v3962_v23 = vld [vmem:[#allocation2 + $0x30] sm:$0xfe]  }
 0x3ef   : > { %v2505_v12 = vsel %vm1565_vm13, %v2500_v56, %v2504_v21  ;;  %v2697_v34 = vrot.slane %v3959_v57, 1  ;;  %v3961_v36 = vld [vmem:[#allocation2 + $0x44] ss:$0 sps:$4 sm:$0x11]   ;;  %v1796_v35 = vrot.slane %v3962_v23, 1  ;;  %v3968_v46 = vld [vmem:[#allocation2 + $0x3c] sm:$0xff]  }
 0x3f0   : > { %1668 = vrot.lane.b32.xlu1 %v1613_v25, %s4284_s17  ;;  %v2694_v25 = vrot.slane %v3955_v63, 1  ;;  %v1631_v37 = vrot.slane %v1629_v30, 1  ;;  %v3963_v42 = vld [vmem:[#allocation2 + $0x38] ss:$0 sps:$4 sm:$0x11]   ;;  %v3966_v41 = vld [vmem:[#allocation2 + $0x3c] sm:$0xff]  }
 0x3f1   : > { %2713 = vrot.lane.b32.xlu0 %v2692_v60, %s4289_s11  ;;  %v2507_v60 = vshrl.u32 %v3952_v52, 16  ;;  %v3964_v43 = vld [vmem:[#allocation2 + $0x3c] sm:$0xfe]   ;;  %v1797_v24 = vrot.slane %v3963_v42, 1  ;;  %v2069_v53 = vshll.u32 %v3968_v46, 16  ;;  %v3967_v61 = vld [vmem:[#allocation2 + $0x48] sm:$0xff]  }
 0x3f2   : > { %v2695_v58 = vsel %vm1783_vm12, %v2693_v15, %v2694_v25  ;;  %v1632_v38 = vor.u32 %v1631_v37, %v1627_v28  ;;  %v1799_v39 = vrot.slane %v3964_v43, 1  ;;  %v3969_v52 = vld [vmem:[#allocation2 + $0x44] ss:$0 sps:$4 sm:$0x11]   ;;  %v3978_v15 = vld [vmem:[#allocation2 + $0x48] sm:$0xff]   ;;  %v3980_v30 = vld [vmem:[#allocation2 + $0x54] sm:$0xff]  }
 0x3f3   : > { %v2512_v16 = vor.u32 %v2511_v11, %v2507_v60  ;;  %v1798_v48 = vsel %vm1783_vm12, %v1796_v35, %v1797_v24  ;;  %v2071_v59 = vrot.slane %v2069_v53, 1  ;;  %v2074_v60 = vshll.u32 %v3969_v52, 16  ;;  %v3971_v13 = vld [vmem:[#allocation2 + $0x50] ss:$0 sps:$4 sm:$0x11]   ;;  %s5572_s30 = sld [smem:[#allocation33_spill]] }
 0x3f4   : > { %1814 = vrot.lane.b32.xlu1 %v1795_v27, %s4283_s4  ;;  %v1622_v27 = vshll.u32 %v3957_v17, 16  ;;  %v2086_v63 = vshll.u32 %v3971_v13, 16  ;;  %v3972_v11 = vld [vmem:[#allocation2 + $0x3c] sm:$0xfe]   ;;  %v3974_v17 = vld [vmem:[#allocation2 + $0x48] sm:$0xfe]  }
 0x3f5   : > { %1812 = vrot.lane.b32.xlu0 %v1792_v9, %s4283_s4  ;;  %v1615_v9 = vshrl.u32 %v3956_v62, 16  ;;  %v2517_v22 = vsel %vm1565_vm13, %v2512_v16, %v2516_v14  ;;  %v2076_v10 = vrot.slane %v2074_v60, 1  ;;  %v2247_v54 = vrot.slane %v3972_v11, 1  ;;  %v3982_v43 = vld [vmem:[#allocation2 + $0x48] sm:$0xfe]   ;;  %s5574_s9 = sld [smem:[#allocation36_spill]] }
 0x3f6   : > { %v1624_v32 = vrot.slane %v1622_v27, 1  ;;  %v2519_v57 = vshrl.u32 %v3978_v15, 16  ;;  %v2521_v28 = vshll.u32 %v3978_v15, 16  ;;  %v2531_v23 = vshrl.u32 %v3980_v30, 16  ;;  %s5577_s2 = sld [smem:[#allocation37_spill]]  ;;  %s5578_s20 = sld [smem:[#allocation38_spill]] }
 0x3f7   : > { %v3983_v24 = vld [vmem:[#allocation2 + $0x50] ss:$0 sps:$4 sm:$0x11]   ;;  %vm1468_vm14 = vcmask 31744   ;;  %vm1686_vm15 = vcmask 64544   ;;  %vm1832_vm1 = vcmask 97344  }
 0x3f8   : > { %1903 = vrot.lane.b32.xlu1 %v3939_v29, %s4282_s13  ;;  %v2696_v29 = vrot.slane %v3958_v20, 1  ;;  %v3991_v15 = vld [vmem:[#allocation2 + $0x50] ss:$0 sps:$4 sm:$0x11]   ;;  %vm1921_vm2 = vcmask 130144   ;;  %vm2138_vm3 = vcmask 162944  }
 0x3f9   : > { %1901 = vrot.lane.b32.xlu0 %v3938_v18, %s4282_s13  ;;  %v1617_v18 = vshll.u32 %v3956_v62, 16  ;;  %s5573_s12 = smov %s5572_s30  ;;  %vm2797_vm4 = vcmask 1041408   ;;  %vm2283_vm5 = vcmask 195744   ;;  %vm2373_vm6 = vcmask 228544   ;;  %s5579_s8 = sld [smem:[#allocation17_spill]] }
 0x3fa   : > { %v2698_v33 = vsel %vm1783_vm12, %v2696_v29, %v2697_v34  ;;  %v3979_v29 = vld [vmem:[#allocation2 + $0x50] ss:$0 sps:$4 sm:$0x11]   ;;  %v3984_v34 = vld [vmem:[#allocation2 + $0x48] sm:$0xff]   ;;  %vm2590_vm7 = vcmask 261344   ;;  %vm2735_vm8 = vcmask 294144  }
 0x3fb   : > { %v1619_v26 = vrot.slane %v1617_v18, 1  ;;  %v3975_v18 = vld [vmem:[#allocation2 + $0x50] ss:$0 sps:$4 sm:$0x11]   ;;  %v2526_v37 = vshll.u32 %v3979_v29, 16  ;;  %vm2772_vm9 = vcmask 293888  }
 0x3fc   : > { %2120 = vrot.lane.b32.xlu1 %v2065_v44, %s4285_s24  ;;  %v3965_v44 = vld [vmem:[#allocation2 + $0x44] ss:$0 sps:$4 sm:$0x11]   ;;  %v3997_v29 = vld [vmem:[#allocation2 + $0x5c] ss:$0 sps:$4 sm:$0x11]  }
 0x3fd   : > { %2118 = vrot.lane.b32.xlu0 %v2053_v40, %s4285_s24  ;;  %v1620_v31 = vor.u32 %v1619_v26, %v1615_v9  ;;  %v1634_v40 = vshll.u32 %v3961_v36, 16  ;;  %v2088_v9 = vrot.slane %v2086_v63, 1  ;;  %v2251_v26 = vrot.slane %v3975_v18, 1  ;;  %v3977_v36 = vld [vmem:[#allocation2 + $0x54] sm:$0xff]   ;;  %s5580_s3 = sld [smem:[#allocation18_spill]]  ;;  %s3204_s19 = scalar_lea.sflag [#allocation6], %s4698_s6 }
 0x3fe   : > { %v3992_v18 = vld [vmem:[#allocation2 + $0x54] sm:$0xfe]   ;;  %p5583_p0 = scmp.ne.s32.totalorder %s5529_s7, 0 }
 0x3ff   : > { %v1625_v0 = vsel %vm1565_vm13, %v1620_v31, %v1624_v32  ;;  %v1636_v19 = vrot.slane %v1634_v40, 1  ;;  %v2523_v32 = vrot.slane %v2521_v28, 1  ;;  %v2528_v40 = vrot.slane %v2526_v37, 1  ;;  %s3620_s10 = sshll.u32 %s5579_s8, 4 }
 0x400   : > { %2265 = vrot.lane.b32.xlu1 %v2246_v50, %s4286_s15  ;;  %v2067_v50 = vshrl.u32 %v3968_v46, 16 }
 0x401   : > { %2263 = vrot.lane.b32.xlu0 %v2243_v47, %s4286_s15  ;;  %v3970_v47 = vld [vmem:[#allocation2 + $0x48] sm:$0xff]   ;;  %v1637_v45 = vsel %vm1565_vm13, %v1632_v38, %v1636_v19  ;;  %v2524_v38 = vor.u32 %v2523_v32, %v2519_v57  ;;  %v1639_v19 = vshrl.u32 %v3984_v34, 16  ;;  %v3996_v57 = vld [vmem:[#allocation2 + $0x54] sm:$0xff]   ;;  %v3998_v32 = vld [vmem:[#allocation2 + $0x60] sm:$0xff]  }
 0x402   : > { %v2081_v56 = vshll.u32 %v3970_v47, 16  ;;  %v2072_v21 = vor.u32 %v2071_v59, %v2067_v50 }
 0x403   : > { %s3589_s25 = sshll.u32 %s5580_s3, 5 }
 0x404   : > { %2355 = vrot.lane.b32.xlu1 %v3949_v55, %s4287_s21  ;;  %v2079_v55 = vshrl.u32 %v3970_v47, 16  ;;  %v2083_v62 = vrot.slane %v2081_v56, 1  ;;  %v2077_v25 = vsel %vm1565_vm13, %v2072_v21, %v2076_v10  ;;  %v2699_v47 = vrot.slane %v3982_v43, 1  ;;  %v3987_v56 = vld [vmem:[#allocation2 + $0x5c] ss:$0 sps:$4 sm:$0x11]  }
 0x405   : > { %2353 = vrot.lane.b32.xlu0 %v3948_v49, %s4287_s21  ;;  %v1800_v49 = vrot.slane %v3965_v44, 1  ;;  %v1641_v44 = vshll.u32 %v3984_v34, 16  ;;  %v4000_v43 = vld [vmem:[#allocation2 + $0x54] sm:$0xfe]  }
 0x406   : > { %v2084_v14 = vor.u32 %v2083_v62, %v2079_v55  ;;  %v3986_v55 = vld [vmem:[#allocation2 + $0x54] sm:$0xfe]   ;;  %v3989_v62 = vld [vmem:[#allocation2 + $0x5c] ss:$0 sps:$4 sm:$0x11]  }
 0x407   : > { %v1801_v51 = vsel %vm1783_vm12, %v1799_v39, %v1800_v49  ;;  %v3985_v49 = vld [vmem:[#allocation2 + $0x50] ss:$0 sps:$4 sm:$0x11]   ;;  %v1643_v50 = vrot.slane %v1641_v44, 1  ;;  %v2702_v13 = vrot.slane %v3986_v55, 1  ;;  %v1658_v11 = vshll.u32 %v3989_v62, 16 }
 0x408   : > { %2572 = vrot.lane.b32.xlu1 %v2517_v22, %s4288_s5  ;;  %v2089_v20 = vsel %vm1565_vm13, %v2084_v14, %v2088_v9  ;;  %v2250_v22 = vrot.slane %v3974_v17, 1  ;;  %v1646_v53 = vshll.u32 %v3985_v49, 16  ;;  %v3990_v14 = vld [vmem:[#allocation2 + $0x48] sm:$0xfe]   ;;  %v1803_v17 = vrot.slane %v3991_v15, 1  ;;  %v4007_v55 = vld [vmem:[#allocation2 + $0x60] sm:$0xff]  }
 0x409   : > { %2570 = vrot.lane.b32.xlu0 %v2505_v12, %s4288_s5  ;;  %v3973_v12 = vld [vmem:[#allocation2 + $0x44] ss:$0 sps:$4 sm:$0x11]   ;;  %v1644_v52 = vor.u32 %v1643_v50, %v1639_v19  ;;  %v1660_v9 = vrot.slane %v1658_v11, 1 }
 0x40a   : > { %v2248_v16 = vrot.slane %v3973_v12, 1  ;;  %v2252_v31 = vsel %vm1783_vm12, %v2250_v22, %v2251_v26  ;;  %v1648_v60 = vrot.slane %v1646_v53, 1  ;;  %v1805_v26 = vrot.slane %v3992_v18, 1  ;;  %v4003_v49 = vld [vmem:[#allocation2 + $0x68] ss:$0 sps:$4 sm:$0x11]  }
 0x40b   : > { %v4010_v11 = vld [vmem:[#allocation2 + $0x74] ss:$0 sps:$4 sm:$0x11]  }
 0x40c   : > { %1670 = vrot.lane.b32.xlu1 %v1625_v0, %s4284_s17  ;;  %v2249_v27 = vsel %vm1783_vm12, %v2247_v54, %v2248_v16  ;;  %v3981_v0 = vld [vmem:[#allocation2 + $0x5c] ss:$0 sps:$4 sm:$0x11]   ;;  %v1649_v63 = vsel %vm1565_vm13, %v1644_v52, %v1648_v60  ;;  %v1802_v54 = vrot.slane %v3990_v14, 1  ;;  %v4006_v52 = vld [vmem:[#allocation2] sm:$0xff]  }
 0x40d   : > { %2715 = vrot.lane.b32.xlu0 %v2695_v58, %s4289_s11  ;;  %v3976_v58 = vld [vmem:[#allocation2 + $0x48] sm:$0xff]   ;;  %v2538_v35 = vshll.u32 %v3981_v0, 16  ;;  %v2098_v0 = vshll.u32 %v3997_v29, 16  ;;  %1469 = vst.msk [vmem:[#allocation3] sm:$0xff] %vm1468_vm14, %v4006_v52 }
 0x40e   : > { %v1804_v28 = vsel %vm1783_vm12, %v1802_v54, %v1803_v17  ;;  %v4008_v60 = vld [vmem:[#allocation2 + $0x68] ss:$0 sps:$4 sm:$0x11]  }
 0x40f   : > { %v2540_v39 = vrot.slane %v2538_v35, 1 }
 0x410   : > { %1672 = vrot.lane.b32.xlu1 %v1637_v45, %s4284_s17  ;;  %v2529_v45 = vsel %vm1565_vm13, %v2524_v38, %v2528_v40  ;;  %v2105_v38 = vshll.u32 %v3998_v32, 16 }
 0x411   : > { %2717 = vrot.lane.b32.xlu0 %v2698_v33, %s4289_s11  ;;  %v2533_v33 = vshll.u32 %v3980_v30, 16  ;;  %v2091_v30 = vshrl.u32 %v3996_v57, 16 }
 0x412   : > { %v2107_v19 = vrot.slane %v2105_v38, 1 }
 0x413   : > { %v2535_v42 = vrot.slane %v2533_v33, 1  ;;  %v2103_v33 = vshrl.u32 %v3998_v32, 16  ;;  %v4014_v32 = vld [vmem:[#allocation2 + $0x6c] sm:$0xfe]  }
 0x414   : > { %1818 = vrot.lane.b32.xlu1 %v1801_v51, %s4283_s4 }
 0x415   : > { %1816 = vrot.lane.b32.xlu0 %v1798_v48, %s4283_s4  ;;  %v2536_v46 = vor.u32 %v2535_v42, %v2531_v23  ;;  %v2700_v48 = vrot.slane %v3983_v24, 1  ;;  %v3999_v23 = vld [vmem:[#allocation2 + $0x68] ss:$0 sps:$4 sm:$0x11]   ;;  %v2100_v42 = vrot.slane %v2098_v0, 1 }
 0x416   : > { %v2110_v35 = vshll.u32 %v3999_v23, 16  ;;  %v4001_v24 = vld [vmem:[#allocation2 + $0x5c] ss:$0 sps:$4 sm:$0x11]  }
 0x417   : > { %v2541_v51 = vsel %vm1565_vm13, %v2536_v46, %v2540_v39  ;;  %v2701_v59 = vsel %vm1783_vm12, %v2699_v47, %v2700_v48  ;;  %v2253_v46 = vrot.slane %v4000_v43, 1  ;;  %v2108_v47 = vor.u32 %v2107_v19, %v2103_v33  ;;  %v4002_v48 = vld [vmem:[#allocation2 + $0x60] sm:$0xfe]   ;;  %v4020_v19 = vld [vmem:[%s5573_s12 + $0x10] ss:$0 sps:$4 sm:$0x33]  }
 0x418   : > { %1907 = vrot.lane.b32.xlu1 %v3967_v61, %s4282_s13  ;;  %v2703_v61 = vrot.slane %v3987_v56, 1  ;;  %v2112_v44 = vrot.slane %v2110_v35, 1  ;;  %v2708_v33 = vrot.slane %v4014_v32, 1  ;;  %v4018_v35 = vld [vmem:[%s5573_s12 + $0x8] sm:$0xff]  }
 0x419   : > { %1905 = vrot.lane.b32.xlu0 %v3966_v41, %s4282_s13  ;;  %v3988_v41 = vld [vmem:[#allocation2 + $0x54] sm:$0xff]   ;;  %v4019_v43 = vld [vmem:[#allocation2 + $0x24] sm:$0xff]  }
 0x41a   : > { %v1651_v21 = vshrl.u32 %v3988_v41, 16  ;;  %v1653_v10 = vshll.u32 %v3988_v41, 16  ;;  %v2113_v50 = vsel %vm1565_vm13, %v2108_v47, %v2112_v44  ;;  %v2256_v41 = vrot.slane %v4002_v48, 1  ;;  %1472 = vst.msk [vmem:[#allocation3 + $0x18] sm:$0xff] %vm1468_vm14, %v4019_v43  ;;  %v4023_v47 = vld [vmem:[#allocation2 + $0x48] sm:$0xff]   ;;  %v4024_v48 = vld [vmem:[#allocation2 + $0x54] sm:$0xff]  }
 0x41b   : > { %1475 = vst.msk [vmem:[#allocation3 + $0x30] sm:$0xff] %vm1468_vm14, %v4023_v47  ;;  %1476 = vst.msk [vmem:[#allocation3 + $0x38] sm:$0xff] %vm1468_vm14, %v4024_v48 }
 0x41c   : > { %2124 = vrot.lane.b32.xlu1 %v2089_v20, %s4285_s24  ;;  %v1655_v12 = vrot.slane %v1653_v10, 1  ;;  %v3993_v20 = vld [vmem:[#allocation2 + $0x5c] ss:$0 sps:$4 sm:$0x11]   ;;  %v2545_v10 = vshll.u32 %v4007_v55, 16 }
 0x41d   : > { %2122 = vrot.lane.b32.xlu0 %v2077_v25, %s4285_s24  ;;  %v2704_v25 = vsel %vm1783_vm12, %v2702_v13, %v2703_v61  ;;  %v4009_v13 = vld [vmem:[#allocation2 + $0x6c] sm:$0xff]  }
 0x41e   : > { %v1656_v16 = vor.u32 %v1655_v12, %v1651_v21  ;;  %v2543_v21 = vshrl.u32 %v4007_v55, 16  ;;  %v2547_v14 = vrot.slane %v2545_v10, 1  ;;  %v2555_v12 = vshrl.u32 %v4009_v13, 16 }
 0x41f   : > { %v2557_v15 = vshll.u32 %v4009_v13, 16 }
 0x420   : > { %2269 = vrot.lane.b32.xlu1 %v2252_v31, %s4286_s15  ;;  %v1661_v22 = vsel %vm1565_vm13, %v1656_v16, %v1660_v9  ;;  %v2093_v31 = vshll.u32 %v3996_v57, 16  ;;  %v4005_v9 = vld [vmem:[#allocation2 + $0x6c] sm:$0xff]   ;;  %v2562_v16 = vshll.u32 %v4010_v11, 16  ;;  %v2548_v17 = vor.u32 %v2547_v14, %v2543_v21 }
 0x421   : > { %2267 = vrot.lane.b32.xlu0 %v2249_v27, %s4286_s15  ;;  %v1806_v27 = vrot.slane %v3993_v20, 1  ;;  %v2559_v18 = vrot.slane %v2557_v15, 1 }
 0x422   : > { %v2095_v37 = vrot.slane %v2093_v31, 1 }
 0x423   : > { %v1807_v34 = vsel %vm1783_vm12, %v1805_v26, %v1806_v27  ;;  %v4012_v26 = vld [vmem:[#allocation2 + $0x60] sm:$0xfe]  }
 0x424   : > { %2359 = vrot.lane.b32.xlu1 %v3977_v36, %s4287_s21  ;;  %v3995_v36 = vld [vmem:[#allocation2 + $0x60] sm:$0xff]   ;;  %v2096_v40 = vor.u32 %v2095_v37, %v2091_v30  ;;  %v2705_v29 = vrot.slane %v4012_v26, 1 }
 0x425   : > { %2357 = vrot.lane.b32.xlu0 %v3976_v58, %s4287_s21  ;;  %v3994_v58 = vld [vmem:[#allocation2 + $0x54] sm:$0xff]  }
 0x426   : > { %v2101_v39 = vsel %vm1565_vm13, %v2096_v40, %v2100_v42  ;;  %v4017_v40 = vld [vmem:[#allocation2 + $0x18] sm:$0xff]  }
 0x427   : > { %1471 = vst.msk [vmem:[#allocation3 + $0x10] sm:$0xff] %vm1468_vm14, %v4017_v40 }
 0x428   : > { %2576 = vrot.lane.b32.xlu1 %v2541_v51, %s4288_s5  ;;  %v2257_v51 = vrot.slane %v4003_v49, 1 }
 0x429   : > { %2574 = vrot.lane.b32.xlu0 %v2529_v45, %s4288_s5  ;;  %v2254_v45 = vrot.slane %v4001_v24, 1  ;;  %v4021_v24 = vld [vmem:[#allocation2 + $0x30] sm:$0xff]  }
 0x42a   : > { %v2258_v61 = vsel %vm1783_vm12, %v2256_v41, %v2257_v51  ;;  %1473 = vst.msk [vmem:[#allocation3 + $0x20] sm:$0xff] %vm1468_vm14, %v4021_v24 }
 0x42b   : > { %v2255_v53 = vsel %vm1783_vm12, %v2253_v46, %v2254_v45  ;;  %v4022_v46 = vld [vmem:[#allocation2 + $0x3c] sm:$0xff]   ;;  %v2799_v45 = vsel %vm2797_vm4, %v4020_v19, 0 }
 0x42c   : > { %1674 = vrot.lane.b32.xlu1 %v1649_v63, %s4284_s17  ;;  %v2550_v63 = vshll.u32 %v4008_v60, 16  ;;  %1474 = vst.msk [vmem:[#allocation3 + $0x28] sm:$0xff] %vm1468_vm14, %v4022_v46 }
 0x42d   : > { %2719 = vrot.lane.b32.xlu0 %v2701_v59, %s4289_s11  ;;  %v4004_v59 = vld [vmem:[#allocation2 + $0x60] sm:$0xff]  }
 0x42e   : > { %v2552_v54 = vrot.slane %v2550_v63, 1 }
 0x430   : > { %1676 = vrot.lane.b32.xlu1 %v1661_v22, %s4284_s17  ;;  %v2564_v22 = vrot.slane %v2562_v16, 1  ;;  %v2553_v57 = vsel %vm1565_vm13, %v2548_v17, %v2552_v54  ;;  %s3220_s17 = sshll.u32 %s4971_s29, 4  ;;  %s5373_s17 = int_to_ptr.vmem [resolvable:$true] %s3220_s17 }
 0x431   : > { %2721 = vrot.lane.b32.xlu0 %v2704_v25, %s4289_s11  ;;  %v4011_v25 = vld [vmem:[#allocation2 + $0xc] sm:$0xff]  }
 0x432   : > { %1470 = vst.msk [vmem:[#allocation3 + $0x8] sm:$0xff] %vm1468_vm14, %v4011_v25 }
 0x434   : > { %1822 = vrot.lane.b32.xlu1 %v1807_v34, %s4283_s4  ;;  %v4015_v34 = vld [vmem:[#allocation2 + $0x74] ss:$0 sps:$4 sm:$0x11]  }
 0x435   : > { %1820 = vrot.lane.b32.xlu0 %v1804_v28, %s4283_s4  ;;  %v2560_v28 = vor.u32 %v2559_v18, %v2555_v12  ;;  %v2709_v38 = vrot.slane %v4015_v34, 1 }
 0x437   : > { %v2565_v30 = vsel %vm1565_vm13, %v2560_v28, %v2564_v22  ;;  %v2710_v42 = vsel %vm1783_vm12, %v2708_v33, %v2709_v38 }
 0x438   : > { %1911 = vrot.lane.b32.xlu1 %v3995_v36, %s4282_s13  ;;  %v4016_v36 = vld [vmem:[%s5572_s30] sm:$0xff]   ;;  %s4290_s30 = smov [#allocation10]  }
 0x439   : > { %1909 = vrot.lane.b32.xlu0 %v3994_v58, %s4282_s13  ;;  %v4013_v58 = vld [vmem:[#allocation2 + $0x68] ss:$0 sps:$4 sm:$0x11]   ;;  %3684 = vmatprep.subr.bf16.mxu0 %v4016_v36  ;;  %s4119_s14 = sshll.u32 %s4290_s30, 4  ;;  %s4120_s14 = int_to_ptr.vmem [resolvable:$false] %s4119_s14 }
 0x43a   : > { %v2706_v31 = vrot.slane %v4013_v58, 1  ;;  %3685 = vmatpush3.bf16.msra.mxu0 %v4016_v36  ;;  %p4122_p2 = scmp.lt.s32.totalorder %s5373_s17, %s4120_s14 }
 0x43b   : > { %3686 = vmatprep.subr.bf16.mxu0 %v4018_v35 }
 0x43c   : > { %2128 = vrot.lane.b32.xlu1 %v2113_v50, %s4285_s24  ;;  %v2707_v23 = vsel %vm1783_vm12, %v2705_v29, %v2706_v31 }
 0x43d   : > { %2126 = vrot.lane.b32.xlu0 %v2101_v39, %s4285_s24  ;;  %s5575_s24 = sld [smem:[#allocation34_spill]] }
 0x43e   : > { %v1898_v56 = vpop.permute.xlu0 %1897  ;;  %3687 = vmatpush3.bf16.msra.mxu0 %v4018_v35 }
 0x43f   : > { %3726 = vmatprep.subr.msk.bf16.mxu0 %vm2797_vm4, %v4020_v19 }
 0x440   : > { %2273 = vrot.lane.b32.xlu1 %v2258_v61, %s4286_s15 }
 0x441   : > { %2271 = vrot.lane.b32.xlu0 %v2255_v53, %s4286_s15 }
 0x442   : > { %v1809_v62 = vpop.permute.xlu1 %1808  ;;  %3689 = vmatpush3.bf16.msra.mxu0 %v2799_v45 }
 0x444   : > { %2363 = vrot.lane.b32.xlu1 %v4005_v9, %s4287_s21 }
 0x445   : > { %2361 = vrot.lane.b32.xlu0 %v4004_v59, %s4287_s21  ;;  %s5581_s21 = sld [smem:[#allocation39_spill]] }
 0x446   : > { %v1811_v27 = vpop.permute.xlu1 %1810 }
 0x447   : > { %v1663_v20 = vpop.permute.xlu0 %1662 }
 0x448   : > { %1687 = vst.msk [vmem:[#allocation3] sm:$0xff] %vm1686_vm15, %v1663_v20  ;;  %2580 = vrot.lane.b32.xlu1 %v2565_v30, %s4288_s5 }
 0x449   : > { %1833 = vst.msk [vmem:[#allocation3] sm:$0xff] %vm1832_vm1, %v1809_v62  ;;  %2578 = vrot.lane.b32.xlu0 %v2553_v57, %s4288_s5  ;;  %s5576_s5 = sld [smem:[#allocation35_spill]] }
 0x44a   : > { %1922 = vst.msk [vmem:[#allocation3] sm:$0xff] %vm1921_vm2, %v1898_v56  ;;  %v1900_v0 = vpop.permute.xlu1 %1899 }
 0x44b   : > { %v1665_v37 = vpop.permute.xlu0 %1664 }
 0x44c   : > { %1688 = vst.msk [vmem:[#allocation3 + $0x8] sm:$0xff] %vm1686_vm15, %v1665_v37  ;;  %2725 = vrot.lane.b32.xlu1 %v2710_v42, %s4289_s11 }
 0x44d   : > { %1834 = vst.msk [vmem:[#allocation3 + $0x8] sm:$0xff] %vm1832_vm1, %v1811_v27  ;;  %2723 = vrot.lane.b32.xlu0 %v2707_v23, %s4289_s11 }
 0x44e   : > { %1923 = vst.msk [vmem:[#allocation3 + $0x8] sm:$0xff] %vm1921_vm2, %v1900_v0  ;;  %v2117_v39 = vpop.permute.xlu1 %2116 }
 0x44f   : > { %v2115_v44 = vpop.permute.xlu0 %2114  ;;  %2140 = vst.msk [vmem:[#allocation3 + $0x8] sm:$0xff] %vm2138_vm3, %v2117_v39 }
 0x450   : > { %2139 = vst.msk [vmem:[#allocation3] sm:$0xff] %vm2138_vm3, %v2115_v44 }
 0x452   : > { %v2262_v50 = vpop.permute.xlu1 %2261 }
 0x453   : > { %v2260_v49 = vpop.permute.xlu0 %2259  ;;  %2285 = vst.msk [vmem:[#allocation3 + $0x8] sm:$0xff] %vm2283_vm5, %v2262_v50 }
 0x454   : > { %2284 = vst.msk [vmem:[#allocation3] sm:$0xff] %vm2283_vm5, %v2260_v49 }
 0x456   : > { %v2352_v51 = vpop.permute.xlu1 %2351 }
 0x457   : > { %v2350_v41 = vpop.permute.xlu0 %2349  ;;  %2375 = vst.msk [vmem:[#allocation3 + $0x8] sm:$0xff] %vm2373_vm6, %v2352_v51 }
 0x458   : > { %2374 = vst.msk [vmem:[#allocation3] sm:$0xff] %vm2373_vm6, %v2350_v41 }
 0x45a   : > { %v2569_v53 = vpop.permute.xlu1 %2568 }
 0x45b   : > { %v2567_v52 = vpop.permute.xlu0 %2566  ;;  %2592 = vst.msk [vmem:[#allocation3 + $0x8] sm:$0xff] %vm2590_vm7, %v2569_v53 }
 0x45c   : > { %2591 = vst.msk [vmem:[#allocation3] sm:$0xff] %vm2590_vm7, %v2567_v52 }
 0x45e   : > { %v1667_v56 = vpop.permute.xlu1 %1666 }
 0x45f   : > { %v2712_v55 = vpop.permute.xlu0 %2711  ;;  %1689 = vst.msk [vmem:[#allocation3 + $0x10] sm:$0xff] %vm1686_vm15, %v1667_v56  ;;  %v2968_v56 = vld [vmem:[%s5574_s9] sm:$0x3]  ;;  %s3217_s9 = sadd.s32 %s3620_s10, %s3589_s25 }
 0x460   : > { %2736 = vst.msk [vmem:[#allocation3] sm:$0xff] %vm2735_vm8, %v2712_v55  ;;  %3727 = vmatprep.subr.msk.bf16.mxu1 %vm2797_vm4, %v2968_v56  ;;  %s3590_s13 = sshll.u32 %s3217_s9, 7 }
 0x461   : > { %s5369_s11 = scalar_lea.hbm %s5581_s21, %s3590_s13 }
 0x462   : > { %v1669_v60 = vpop.permute.xlu1 %1668 }
 0x463   : > { %v2714_v59 = vpop.permute.xlu0 %2713  ;;  %1690 = vst.msk [vmem:[#allocation3 + $0x18] sm:$0xff] %vm1686_vm15, %v1669_v60  ;;  %v2994_v60 = vsel %vm2797_vm4, %v2968_v56, 0 }
 0x464   : > { %2737 = vst.msk [vmem:[#allocation3 + $0x8] sm:$0xff] %vm2735_vm8, %v2714_v59  ;;  %3707 = vmatpush3.bf16.msra.mxu1 %v2994_v60 }
 0x466   : > { %v1815_v62 = vpop.permute.xlu1 %1814 }
 0x467   : > { %v1813_v13 = vpop.permute.xlu0 %1812  ;;  %v2744_v61 = vld [vmem:[#allocation3] sm:$0xff]  ;;  %1836 = vst.msk [vmem:[#allocation3 + $0x18] sm:$0xff] %vm1832_vm1, %v1815_v62  ;;  %v5237_v62 = vld [vmem:[%s5576_s5] ss:$0 sm:$0xff]  ;;  %s5582_s5 = smov %s5581_s21 }
 0x468   : > { %1835 = vst.msk [vmem:[#allocation3 + $0x10] sm:$0xff] %vm1832_vm1, %v1813_v13  ;;  %3690 = vmatprep.mubr.msk.bf16.mxu0 %vm2772_vm9, %v2744_v61  ;;  %v5232_v13 = vld [vmem:[%s5575_s24] ss:$0 sm:$0xff] }
 0x46a   : > { %v1904_v63 = vpop.permute.xlu1 %1903 }
 0x46b   : > { %v1902_v21 = vpop.permute.xlu0 %1901  ;;  %v2745_v10 = vld [vmem:[#allocation3 + $0x8] sm:$0xff]  ;;  %1925 = vst.msk [vmem:[#allocation3 + $0x18] sm:$0xff] %vm1921_vm2, %v1904_v63 }
 0x46c   : > { %1924 = vst.msk [vmem:[#allocation3 + $0x10] sm:$0xff] %vm1921_vm2, %v1902_v21  ;;  %3691 = vmatmul.mubr.msk.bf16.vlgmr.msra.gmra.mrb[0].mxu0 %vm2772_vm9, %v2745_v10 }
 0x46e   : > { %v2121_v14 = vpop.permute.xlu1 %2120 }
 0x46f   : > { %v2119_v11 = vpop.permute.xlu0 %2118  ;;  %2142 = vst.msk [vmem:[#allocation3 + $0x18] sm:$0xff] %vm2138_vm3, %v2121_v14 }
 0x470   : > { %2141 = vst.msk [vmem:[#allocation3 + $0x10] sm:$0xff] %vm2138_vm3, %v2119_v11 }
 0x472   : > { %v2266_v15 = vpop.permute.xlu1 %2265 }
 0x473   : > { %v2264_v12 = vpop.permute.xlu0 %2263  ;;  %2287 = vst.msk [vmem:[#allocation3 + $0x18] sm:$0xff] %vm2283_vm5, %v2266_v15 }
 0x474   : > { %2286 = vst.msk [vmem:[#allocation3 + $0x10] sm:$0xff] %vm2283_vm5, %v2264_v12 }
 0x476   : > { %v2356_v9 = vpop.permute.xlu1 %2355 }
 0x477   : > { %v2354_v25 = vpop.permute.xlu0 %2353  ;;  %2377 = vst.msk [vmem:[#allocation3 + $0x18] sm:$0xff] %vm2373_vm6, %v2356_v9 }
 0x478   : > { %2376 = vst.msk [vmem:[#allocation3 + $0x10] sm:$0xff] %vm2373_vm6, %v2354_v25 }
 0x47a   : > { %v2573_v16 = vpop.permute.xlu1 %2572 }
 0x47b   : > { %v2571_v54 = vpop.permute.xlu0 %2570  ;;  %2594 = vst.msk [vmem:[#allocation3 + $0x18] sm:$0xff] %vm2590_vm7, %v2573_v16 }
 0x47c   : > { %2593 = vst.msk [vmem:[#allocation3 + $0x10] sm:$0xff] %vm2590_vm7, %v2571_v54 }
 0x47e   : > { %v1671_v18 = vpop.permute.xlu1 %1670 }
 0x47f   : > { %v2716_v17 = vpop.permute.xlu0 %2715  ;;  %1691 = vst.msk [vmem:[#allocation3 + $0x20] sm:$0xff] %vm1686_vm15, %v1671_v18 }
 0x480   : > { %2738 = vst.msk [vmem:[#allocation3 + $0x10] sm:$0xff] %vm2735_vm8, %v2716_v17 }
 0x482   : > { %v1673_v22 = vpop.permute.xlu1 %1672 }
 0x483   : > { %v2718_v20 = vpop.permute.xlu0 %2717  ;;  %1692 = vst.msk [vmem:[#allocation3 + $0x28] sm:$0xff] %vm1686_vm15, %v1673_v22 }
 0x484   : > { %2739 = vst.msk [vmem:[#allocation3 + $0x18] sm:$0xff] %vm2735_vm8, %v2718_v20 }
 0x486   : > { %v1819_v57 = vpop.permute.xlu1 %1818 }
 0x487   : > { %v1817_v26 = vpop.permute.xlu0 %1816  ;;  %v2746_v27 = vld [vmem:[#allocation3 + $0x10] sm:$0xff]  ;;  %1838 = vst.msk [vmem:[#allocation3 + $0x28] sm:$0xff] %vm1832_vm1, %v1819_v57 }
 0x488   : > { %1837 = vst.msk [vmem:[#allocation3 + $0x20] sm:$0xff] %vm1832_vm1, %v1817_v26  ;;  %3694 = vmatprep.mubr.msk.bf16.mxu0 %vm2772_vm9, %v2746_v27 }
 0x48a   : > { %v1908_v29 = vpop.permute.xlu1 %1907 }
 0x48b   : > { %v1906_v28 = vpop.permute.xlu0 %1905  ;;  %v2747_v58 = vld [vmem:[#allocation3 + $0x18] sm:$0xff]  ;;  %1927 = vst.msk [vmem:[#allocation3 + $0x28] sm:$0xff] %vm1921_vm2, %v1908_v29 }
 0x48c   : > { %1926 = vst.msk [vmem:[#allocation3 + $0x20] sm:$0xff] %vm1921_vm2, %v1906_v28  ;;  %3695 = vmatmul.mubr.msk.bf16.gmra.mrb[4].mxu0 %vm2772_vm9, %v2747_v58 }
 0x48e   : > { %v2125_v31 = vpop.permute.xlu1 %2124 }
 0x48f   : > { %v2123_v30 = vpop.permute.xlu0 %2122  ;;  %2144 = vst.msk [vmem:[#allocation3 + $0x28] sm:$0xff] %vm2138_vm3, %v2125_v31 }
 0x490   : > { %2143 = vst.msk [vmem:[#allocation3 + $0x20] sm:$0xff] %vm2138_vm3, %v2123_v30 }
 0x492   : > { %v2270_v34 = vpop.permute.xlu1 %2269 }
 0x493   : > { %v2268_v32 = vpop.permute.xlu0 %2267  ;;  %2289 = vst.msk [vmem:[#allocation3 + $0x28] sm:$0xff] %vm2283_vm5, %v2270_v34 }
 0x494   : > { %2288 = vst.msk [vmem:[#allocation3 + $0x20] sm:$0xff] %vm2283_vm5, %v2268_v32 }
 0x496   : > { %v2360_v37 = vpop.permute.xlu1 %2359 }
 0x497   : > { %v2358_v36 = vpop.permute.xlu0 %2357  ;;  %2379 = vst.msk [vmem:[#allocation3 + $0x28] sm:$0xff] %vm2373_vm6, %v2360_v37 }
 0x498   : > { %2378 = vst.msk [vmem:[#allocation3 + $0x20] sm:$0xff] %vm2373_vm6, %v2358_v36 }
 0x49a   : > { %v2577_v23 = vpop.permute.xlu1 %2576 }
 0x49b   : > { %v2575_v0 = vpop.permute.xlu0 %2574  ;;  %2596 = vst.msk [vmem:[#allocation3 + $0x28] sm:$0xff] %vm2590_vm7, %v2577_v23 }
 0x49c   : > { %2595 = vst.msk [vmem:[#allocation3 + $0x20] sm:$0xff] %vm2590_vm7, %v2575_v0 }
 0x49e   : > { %v1675_v38 = vpop.permute.xlu1 %1674 }
 0x49f   : > { %v2720_v33 = vpop.permute.xlu0 %2719  ;;  %1693 = vst.msk [vmem:[#allocation3 + $0x30] sm:$0xff] %vm1686_vm15, %v1675_v38 }
 0x4a0   : > { %2740 = vst.msk [vmem:[#allocation3 + $0x20] sm:$0xff] %vm2735_vm8, %v2720_v33 }
 0x4a2   : > { %v1677_v42 = vpop.permute.xlu1 %1676 }
 0x4a3   : > { %v2722_v40 = vpop.permute.xlu0 %2721  ;;  %1694 = vst.msk [vmem:[#allocation3 + $0x38] sm:$0xff] %vm1686_vm15, %v1677_v42 }
 0x4a4   : > { %2741 = vst.msk [vmem:[#allocation3 + $0x28] sm:$0xff] %vm2735_vm8, %v2722_v40 }
 0x4a6   : > { %v1823_v19 = vpop.permute.xlu1 %1822 }
 0x4a7   : > { %v1821_v35 = vpop.permute.xlu0 %1820  ;;  %v2748_v43 = vld [vmem:[#allocation3 + $0x20] sm:$0xff]  ;;  %1840 = vst.msk [vmem:[#allocation3 + $0x38] sm:$0xff] %vm1832_vm1, %v1823_v19 }
 0x4a8   : > { %1839 = vst.msk [vmem:[#allocation3 + $0x30] sm:$0xff] %vm1832_vm1, %v1821_v35  ;;  %3698 = vmatprep.mubr.msk.bf16.mxu0 %vm2772_vm9, %v2748_v43 }
 0x4aa   : > { %v1912_v46 = vpop.permute.xlu1 %1911 }
 0x4ab   : > { %v1910_v24 = vpop.permute.xlu0 %1909  ;;  %v2749_v44 = vld [vmem:[#allocation3 + $0x28] sm:$0xff]  ;;  %1929 = vst.msk [vmem:[#allocation3 + $0x38] sm:$0xff] %vm1921_vm2, %v1912_v46 }
 0x4ac   : > { %1928 = vst.msk [vmem:[#allocation3 + $0x30] sm:$0xff] %vm1921_vm2, %v1910_v24  ;;  %3699 = vmatmul.mubr.msk.bf16.gmra.mrb[8].mxu0 %vm2772_vm9, %v2749_v44 }
 0x4ae   : > { %v2129_v47 = vpop.permute.xlu1 %2128 }
 0x4af   : > { %v2127_v39 = vpop.permute.xlu0 %2126  ;;  %2146 = vst.msk [vmem:[#allocation3 + $0x38] sm:$0xff] %vm2138_vm3, %v2129_v47 }
 0x4b0   : > { %2145 = vst.msk [vmem:[#allocation3 + $0x30] sm:$0xff] %vm2138_vm3, %v2127_v39 }
 0x4b2   : > { %v2274_v48 = vpop.permute.xlu1 %2273 }
 0x4b3   : > { %v2272_v45 = vpop.permute.xlu0 %2271  ;;  %2291 = vst.msk [vmem:[#allocation3 + $0x38] sm:$0xff] %vm2283_vm5, %v2274_v48 }
 0x4b4   : > { %2290 = vst.msk [vmem:[#allocation3 + $0x30] sm:$0xff] %vm2283_vm5, %v2272_v45 }
 0x4b6   : > { %v2364_v50 = vpop.permute.xlu1 %2363 }
 0x4b7   : > { %v2362_v49 = vpop.permute.xlu0 %2361  ;;  %2381 = vst.msk [vmem:[#allocation3 + $0x38] sm:$0xff] %vm2373_vm6, %v2364_v50 }
 0x4b8   : > { %2380 = vst.msk [vmem:[#allocation3 + $0x30] sm:$0xff] %vm2373_vm6, %v2362_v49 }
 0x4ba   : > { %v2581_v51 = vpop.permute.xlu1 %2580 }
 0x4bb   : > { %v2579_v41 = vpop.permute.xlu0 %2578  ;;  %2598 = vst.msk [vmem:[#allocation3 + $0x38] sm:$0xff] %vm2590_vm7, %v2581_v51 }
 0x4bc   : > { %2597 = vst.msk [vmem:[#allocation3 + $0x30] sm:$0xff] %vm2590_vm7, %v2579_v41 }
 0x4be   : > { %v2726_v53 = vpop.permute.xlu1 %2725 }
 0x4bf   : > { %v2724_v52 = vpop.permute.xlu0 %2723  ;;  %2743 = vst.msk [vmem:[#allocation3 + $0x38] sm:$0xff] %vm2735_vm8, %v2726_v53 }
 0x4c0   : > { %2742 = vst.msk [vmem:[#allocation3 + $0x30] sm:$0xff] %vm2735_vm8, %v2724_v52 }
 0x4c6   : > { %v2751_v59 = vld [vmem:[#allocation3 + $0x38] sm:$0xff] }
 0x4c7   : > { %v2750_v55 = vld [vmem:[#allocation3 + $0x30] sm:$0xff] }
 0x4c8   : > { %3702 = vmatprep.mubr.msk.bf16.mxu0 %vm2772_vm9, %v2750_v55 }
 0x4c9   : > { %3703 = vmatmul.mubr.msk.bf16.gmra.mrb[12].mxu0 %vm2772_vm9, %v2751_v59 }
 0x53f   : > { %v3692_v61 = vpop.f32.mrb[0].mxu0 }
 0x540   : > { %v2907_v21 = vmul.f32 %v3692_v61, %v5232_v13  ;;  %v2835_v10 = vpop.f32.mrb[1].mxu0 }
 0x541   : > { %v2905_v63 = vmul.f32 %v5232_v13, %v2835_v10  ;;  %v3693_v11 = vpop.f32.mrb[2].mxu0 }
 0x542   : > { %v2930_v14 = vadd.f32 %v5237_v62, %v2907_v21  ;;  %v2908_v12 = vmul.f32 %v3693_v11, %v5232_v13  ;;  %v2838_v15 = vpop.f32.mrb[3].mxu0 }
 0x543   : > { %v2928_v25 = vadd.f32 %v5237_v62, %v2905_v63  ;;  %v2906_v9 = vmul.f32 %v5232_v13, %v2838_v15 }
 0x544   : > { %v2931_v54 = vadd.f32 %v5237_v62, %v2908_v12  ;;  %v2946_v17 = vmax.f32 %v2930_v14, 0.0 }
 0x545   : > { %v2929_v16 = vadd.f32 %v5237_v62, %v2906_v9  ;;  %v2944_v20 = vmax.f32 %v2928_v25, 0.0 }
 0x546   : > { %v2947_v18 = vmax.f32 %v2931_v54, 0.0 }
 0x547   : > { %v2945_v22 = vmax.f32 %v2929_v16, 0.0 }
 0x548   : > { %v2961_v26 = vpack.c.bf16 %v2947_v18, %v2946_v17 }
 0x549   : > { %v2960_v27 = vpack.c.bf16 %v2945_v22, %v2944_v20 }
 0x54b   : > { %3708 = vmatprep.mubr.msk.bf16.mxu1 %vm1468_vm14, %v2960_v27 }
 0x54c   : > { %3709 = vmatmul.mubr.msk.bf16.vlgmr.msra.gmra.mrb[0].mxu1 %vm1468_vm14, %v2961_v26 }
 0x55f   : > { %v3696_v57 = vpop.f32.mrb[4].mxu0 }
 0x560   : > { %v2911_v28 = vmul.f32 %v3696_v57, %v5232_v13  ;;  %v2851_v58 = vpop.f32.mrb[5].mxu0  ;;  %v5282_v57 = vld [vmem:[%s5577_s2] ss:$0 sm:$0xff]  ;;  %s4115_s2 = scalar_lea.vmem %s5373_s17, 2048 }
 0x561   : > { %v2909_v29 = vmul.f32 %v5232_v13, %v2851_v58  ;;  %v3697_v30 = vpop.f32.mrb[6].mxu0  ;;  %v3141_v58 = vunpack.c.l.bf16 %v4736_v3  ;;  %p4116_p4 = scmp.ne.s32.totalorder %s5373_s17, %s4115_s2 }
 0x562   : > { %v2934_v31 = vadd.f32 %v5237_v62, %v2911_v28  ;;  %v2912_v32 = vmul.f32 %v3697_v30, %v5232_v13  ;;  %v2854_v34 = vpop.f32.mrb[7].mxu0 }
 0x563   : > { %v2932_v36 = vadd.f32 %v5237_v62, %v2909_v29  ;;  %v2910_v37 = vmul.f32 %v5232_v13, %v2854_v34  ;;  %p4117_p12 = pnand %p4116_p4, %p5583_p0 }
 0x564   : > { %v2935_v0 = vadd.f32 %v5237_v62, %v2912_v32  ;;  %v2950_v33 = vmax.f32 %v2934_v31, 0.0  ;;  %v3139_v31 = vunpack.c.l.bf16 %v4730_v1 }
 0x565   : > { %v2933_v23 = vadd.f32 %v5237_v62, %v2910_v37  ;;  %v2948_v40 = vmax.f32 %v2932_v36, 0.0  ;;  %v3142_v37 = vunpack.c.h.bf16 %v4736_v3  ;;  %p4118_p11 = pneg %p4117_p12 }
 0x566   : > { %v2951_v38 = vmax.f32 %v2935_v0, 0.0 }
 0x567   : > { %v2949_v42 = vmax.f32 %v2933_v23, 0.0 }
 0x568   : > { %v2963_v35 = vpack.c.bf16 %v2951_v38, %v2950_v33  ;;  %v3140_v38 = vunpack.c.h.bf16 %v4730_v1 }
 0x569   : > { %v2962_v43 = vpack.c.bf16 %v2949_v42, %v2948_v40 }
 0x56b   : > { %3712 = vmatprep.mubr.msk.bf16.mxu1 %vm1468_vm14, %v2962_v43 }
 0x56c   : > { %3713 = vmatmul.mubr.msk.bf16.gmra.mrb[4].mxu1 %vm1468_vm14, %v2963_v35 }
 0x57f   : > { %v3700_v19 = vpop.f32.mrb[8].mxu0 }
 0x580   : > { %v2915_v24 = vmul.f32 %v3700_v19, %v5232_v13  ;;  %v2867_v44 = vpop.f32.mrb[9].mxu0 }
 0x581   : > { %v2913_v46 = vmul.f32 %v5232_v13, %v2867_v44  ;;  %v3701_v39 = vpop.f32.mrb[10].mxu0 }
 0x582   : > { %v2938_v47 = vadd.f32 %v5237_v62, %v2915_v24  ;;  %v2916_v45 = vmul.f32 %v3701_v39, %v5232_v13  ;;  %v2870_v48 = vpop.f32.mrb[11].mxu0 }
 0x583   : > { %v2936_v49 = vadd.f32 %v5237_v62, %v2913_v46  ;;  %v2914_v50 = vmul.f32 %v5232_v13, %v2870_v48 }
 0x584   : > { %v2939_v41 = vadd.f32 %v5237_v62, %v2916_v45  ;;  %v2954_v52 = vmax.f32 %v2938_v47, 0.0  ;;  %v3145_v45 = vunpack.c.l.bf16 %v4760_v7 }
 0x585   : > { %v2937_v51 = vadd.f32 %v5237_v62, %v2914_v50  ;;  %v2952_v55 = vmax.f32 %v2936_v49, 0.0  ;;  %v3143_v50 = vunpack.c.l.bf16 %v4742_v5 }
 0x586   : > { %v2955_v53 = vmax.f32 %v2939_v41, 0.0 }
 0x587   : > { %v2953_v56 = vmax.f32 %v2937_v51, 0.0 }
 0x588   : > { %v2965_v59 = vpack.c.bf16 %v2955_v53, %v2954_v52  ;;  %v3146_v53 = vunpack.c.h.bf16 %v4760_v7 }
 0x589   : > { %v2964_v60 = vpack.c.bf16 %v2953_v56, %v2952_v55 }
 0x58b   : > { %3716 = vmatprep.mubr.msk.bf16.mxu1 %vm1468_vm14, %v2964_v60  ;;  %v3144_v60 = vunpack.c.h.bf16 %v4742_v5 }
 0x58c   : > { %3717 = vmatmul.mubr.msk.bf16.gmra.mrb[8].mxu1 %vm1468_vm14, %v2965_v59 }
 0x59c   : > { %v3704_v61 = vpop.f32.mrb[12].mxu0 }
 0x59d   : > { %v2919_v21 = vmul.f32 %v3704_v61, %v5232_v13  ;;  %v2883_v10 = vpop.f32.mrb[13].mxu0 }
 0x59e   : > { %v2917_v63 = vmul.f32 %v5232_v13, %v2883_v10  ;;  %v3705_v11 = vpop.f32.mrb[14].mxu0 }
 0x59f   : > { %v2942_v14 = vadd.f32 %v5237_v62, %v2919_v21  ;;  %v2920_v12 = vmul.f32 %v3705_v11, %v5232_v13  ;;  %v2886_v15 = vpop.f32.mrb[15].mxu0 }
 0x5a0   : > { %v2940_v25 = vadd.f32 %v5237_v62, %v2917_v63  ;;  %v2918_v9 = vmul.f32 %v5232_v13, %v2886_v15 }
 0x5a1   : > { %v2943_v54 = vadd.f32 %v5237_v62, %v2920_v12  ;;  %v2958_v17 = vmax.f32 %v2942_v14, 0.0 }
 0x5a2   : > { %v2941_v16 = vadd.f32 %v5237_v62, %v2918_v9  ;;  %v2956_v20 = vmax.f32 %v2940_v25, 0.0  ;;  %v5287_v62 = vld [vmem:[%s5578_s20] ss:$0 sm:$0xff]  ;;  %s4121_s20 = scalar_lea.vmem %s4120_s14, 4096 }
 0x5a3   : > { %v2959_v18 = vmax.f32 %v2943_v54, 0.0  ;;  %v3149_v54 = vunpack.c.l.bf16 %v4739_v4  ;;  %p4123_p1 = scmp.lt.s32.totalorder %s4121_s20, %s4115_s2 }
 0x5a4   : > { %v2957_v22 = vmax.f32 %v2941_v16, 0.0 }
 0x5a5   : > { %v2967_v26 = vpack.c.bf16 %v2959_v18, %v2958_v17  ;;  %v3147_v18 = vunpack.c.l.bf16 %v4733_v2  ;;  %p4124_p5 = por %p4123_p1, %p4122_p2 }
 0x5a6   : > { %v2966_v27 = vpack.c.bf16 %v2957_v22, %v2956_v20 }
 0x5a7   : > { %p4125_p8 = pnand %p4124_p5, %p4118_p11 }
 0x5a8   : > { %3720 = vmatprep.mubr.msk.bf16.mxu1 %vm1468_vm14, %v2966_v27  ;;  %v3150_v27 = vunpack.c.h.bf16 %v4739_v4 }
 0x5a9   : > { %3721 = vmatmul.mubr.msk.bf16.gmra.mrb[12].mxu1 %vm1468_vm14, %v2967_v26 }
 0x61f   : > { %v3710_v13 = vpop.f32.mrb[0].mxu1 }
 0x620   : > { %v3102_v28 = vmul.f32 %v3710_v13, %v5282_v57  ;;  %v3030_v29 = vpop.f32.mrb[1].mxu1 }
 0x621   : > { %v3100_v30 = vmul.f32 %v5282_v57, %v3030_v29  ;;  %v3711_v32 = vpop.f32.mrb[2].mxu1  ;;  %v3148_v29 = vunpack.c.h.bf16 %v4733_v2 }
 0x622   : > { %v3125_v34 = vadd.f32 %v5287_v62, %v3102_v28  ;;  %v3103_v36 = vmul.f32 %v3711_v32, %v5282_v57  ;;  %v3033_v0 = vpop.f32.mrb[3].mxu1 }
 0x623   : > { %v3123_v23 = vadd.f32 %v5287_v62, %v3100_v30  ;;  %v3101_v33 = vmul.f32 %v5282_v57, %v3033_v0 }
 0x624   : > { %v3157_v40 = vadd.f32 %v3141_v58, %v3125_v34  ;;  %v3126_v42 = vadd.f32 %v5287_v62, %v3103_v36 }
 0x625   : > { %v3155_v35 = vadd.f32 %v3139_v31, %v3123_v23  ;;  %v3124_v43 = vadd.f32 %v5287_v62, %v3101_v33 }
 0x626   : > { %v3173_v19 = vmax.f32 %v3157_v40, 0.0  ;;  %v3158_v24 = vadd.f32 %v3142_v37, %v3126_v42  ;;  %v3153_v40 = vunpack.c.l.bf16 %v4763_v8 }
 0x627   : > { %v3171_v44 = vmax.f32 %v3155_v35, 0.0  ;;  %v3156_v46 = vadd.f32 %v3140_v38, %v3124_v43  ;;  %v3151_v43 = vunpack.c.l.bf16 %v4745_v6 }
 0x628   : > { %3189 = vst.msk [vmem:[%s4971_s29 + $0x10] sm:$0xff] %vm635_vm0, %v3173_v19  ;;  %v3174_v3 = vmax.f32 %v3158_v24, 0.0 }
 0x629   : > { %3187 = vst.msk [vmem:[%s4971_s29] sm:$0xff] %vm635_vm0, %v3171_v44  ;;  %v3172_v39 = vmax.f32 %v3156_v46, 0.0  ;;  %v3154_v46 = vunpack.c.h.bf16 %v4763_v8 }
 0x62a   : > { %3190 = vst.msk [vmem:[%s4971_s29 + $0x18] sm:$0xff] %vm635_vm0, %v3174_v3 }
 0x62b   : > { %3188 = vst.msk [vmem:[%s4971_s29 + $0x8] sm:$0xff] %vm635_vm0, %v3172_v39 }
 0x63f   : > { %v3714_v1 = vpop.f32.mrb[4].mxu1 }
 0x640   : > { %v3106_v47 = vmul.f32 %v3714_v1, %v5282_v57  ;;  %v3046_v48 = vpop.f32.mrb[5].mxu1 }
 0x641   : > { %v3104_v49 = vmul.f32 %v5282_v57, %v3046_v48  ;;  %v3715_v41 = vpop.f32.mrb[6].mxu1 }
 0x642   : > { %v3129_v51 = vadd.f32 %v5287_v62, %v3106_v47  ;;  %v3107_v52 = vmul.f32 %v3715_v41, %v5282_v57  ;;  %v3049_v55 = vpop.f32.mrb[7].mxu1  ;;  %v3152_v47 = vunpack.c.h.bf16 %v4745_v6 }
 0x643   : > { %v3127_v56 = vadd.f32 %v5287_v62, %v3104_v49  ;;  %v3105_v59 = vmul.f32 %v5282_v57, %v3049_v55 }
 0x644   : > { %v3161_v61 = vadd.f32 %v3145_v45, %v3129_v51  ;;  %v3130_v21 = vadd.f32 %v5287_v62, %v3107_v52 }
 0x645   : > { %v3159_v10 = vadd.f32 %v3143_v50, %v3127_v56  ;;  %v3128_v63 = vadd.f32 %v5287_v62, %v3105_v59 }
 0x646   : > { %v3177_v11 = vmax.f32 %v3161_v61, 0.0  ;;  %v3162_v14 = vadd.f32 %v3146_v53, %v3130_v21 }
 0x647   : > { %v3175_v12 = vmax.f32 %v3159_v10, 0.0  ;;  %v3160_v15 = vadd.f32 %v3144_v60, %v3128_v63 }
 0x648   : > { %3193 = vst.msk [vmem:[%s4971_s29 + $0x30] sm:$0xff] %vm635_vm0, %v3177_v11  ;;  %v3178_v7 = vmax.f32 %v3162_v14, 0.0 }
 0x649   : > { %3191 = vst.msk [vmem:[%s4971_s29 + $0x20] sm:$0xff] %vm635_vm0, %v3175_v12  ;;  %v3176_v25 = vmax.f32 %v3160_v15, 0.0 }
 0x64a   : > { %3194 = vst.msk [vmem:[%s4971_s29 + $0x38] sm:$0xff] %vm635_vm0, %v3178_v7 }
 0x64b   : > { %3192 = vst.msk [vmem:[%s4971_s29 + $0x28] sm:$0xff] %vm635_vm0, %v3176_v25 }
 0x65f   : > { %v3718_v5 = vpop.f32.mrb[8].mxu1 }
 0x660   : > { %v3110_v9 = vmul.f32 %v3718_v5, %v5282_v57  ;;  %v3062_v16 = vpop.f32.mrb[9].mxu1 }
 0x661   : > { %v3108_v17 = vmul.f32 %v5282_v57, %v3062_v16  ;;  %v3719_v20 = vpop.f32.mrb[10].mxu1 }
 0x662   : > { %v3133_v22 = vadd.f32 %v5287_v62, %v3110_v9  ;;  %v3111_v26 = vmul.f32 %v3719_v20, %v5282_v57  ;;  %v3065_v13 = vpop.f32.mrb[11].mxu1 }
 0x663   : > { %v3131_v28 = vadd.f32 %v5287_v62, %v3108_v17  ;;  %v3109_v58 = vmul.f32 %v5282_v57, %v3065_v13 }
 0x664   : > { %v3165_v30 = vadd.f32 %v3149_v54, %v3133_v22  ;;  %v3134_v31 = vadd.f32 %v5287_v62, %v3111_v26 }
 0x665   : > { %v3163_v32 = vadd.f32 %v3147_v18, %v3131_v28  ;;  %v3132_v34 = vadd.f32 %v5287_v62, %v3109_v58 }
 0x666   : > { %v3181_v36 = vmax.f32 %v3165_v30, 0.0  ;;  %v3166_v37 = vadd.f32 %v3150_v27, %v3134_v31 }
 0x667   : > { %v3179_v4 = vmax.f32 %v3163_v32, 0.0  ;;  %v3164_v0 = vadd.f32 %v3148_v29, %v3132_v34 }
 0x668   : > { %3197 = vst.msk [vmem:[%s4971_s29 + $0x50] sm:$0xff] %vm635_vm0, %v3181_v36  ;;  %v3182_v23 = vmax.f32 %v3166_v37, 0.0 }
 0x669   : > { %3195 = vst.msk [vmem:[%s4971_s29 + $0x40] sm:$0xff] %vm635_vm0, %v3179_v4  ;;  %v3180_v33 = vmax.f32 %v3164_v0, 0.0 }
 0x66a   : > { %3198 = vst.msk [vmem:[%s4971_s29 + $0x58] sm:$0xff] %vm635_vm0, %v3182_v23 }
 0x66b   : > { %3196 = vst.msk [vmem:[%s4971_s29 + $0x48] sm:$0xff] %vm635_vm0, %v3180_v33 }
 0x67c   : > { %v3722_v2 = vpop.f32.mrb[12].mxu1 }
 0x67d   : > { %v3114_v38 = vmul.f32 %v3722_v2, %v5282_v57  ;;  %v3078_v42 = vpop.f32.mrb[13].mxu1 }
 0x67e   : > { %v3112_v35 = vmul.f32 %v5282_v57, %v3078_v42  ;;  %v3723_v19 = vpop.f32.mrb[14].mxu1 }
 0x67f   : > { %v3137_v24 = vadd.f32 %v5287_v62, %v3114_v38  ;;  %v3115_v44 = vmul.f32 %v3723_v19, %v5282_v57  ;;  %v3081_v3 = vpop.f32.mrb[15].mxu1 }
 0x680   : > { %v3135_v39 = vadd.f32 %v5287_v62, %v3112_v35  ;;  %v3113_v1 = vmul.f32 %v5282_v57, %v3081_v3 }
 0x681   : > { %v3169_v45 = vadd.f32 %v3153_v40, %v3137_v24  ;;  %v3138_v48 = vadd.f32 %v5287_v62, %v3115_v44 }
 0x682   : > { %v3167_v49 = vadd.f32 %v3151_v43, %v3135_v39  ;;  %v3136_v50 = vadd.f32 %v5287_v62, %v3113_v1 }
 0x683   : > { %v3185_v8 = vmax.f32 %v3169_v45, 0.0  ;;  %v3170_v41 = vadd.f32 %v3154_v46, %v3138_v48 }
 0x684   : > { %v3183_v51 = vmax.f32 %v3167_v49, 0.0  ;;  %v3168_v52 = vadd.f32 %v3152_v47, %v3136_v50 }
 0x685   : > { %3201 = vst.msk [vmem:[%s4971_s29 + $0x70] sm:$0xff] %vm635_vm0, %v3185_v8  ;;  %v3186_v57 = vmax.f32 %v3170_v41, 0.0 }
 0x686   : > { %3199 = vst.msk [vmem:[%s4971_s29 + $0x60] sm:$0xff] %vm635_vm0, %v3183_v51  ;;  %v3184_v6 = vmax.f32 %v3168_v52, 0.0 }
 0x687   : > { %3202 = vst.msk [vmem:[%s4971_s29 + $0x78] sm:$0xff] %vm635_vm0, %v3186_v57 }
 0x688   : > { %3200 = vst.msk [vmem:[%s4971_s29 + $0x68] sm:$0xff] %vm635_vm0, %v3184_v6 }
 0x689   : > { %4128 = shalt.err (!%p4125_p8)
}
 0x68a   : > { %s4129_s29 = scalar_lea.hbm %s5369_s11, 2048  ;;  %s4133_s10 = scalar_lea.hbm %s5582_s5, 8192 }
 0x68b   : > { %p4130_p13 = scmp.ne.s32.totalorder %s5369_s11, %s4129_s29  ;;  %p4134_p9 = scmp.lt.u32.totalorder %s5369_s11, %s5582_s5 }
 0x68c   : > { %p4135_p7 = scmp.lt.u32.totalorder %s4133_s10, %s4129_s29  ;;  %p4137_p4 = scmp.lt.u32.totalorder %s4129_s29, %s5369_s11 }
 0x68d   : > { %p4131_p10 = pnand %p4130_p13, %p5583_p0 }
 0x68e   : > { %p4136_p6 = por %p4135_p7, %p4134_p9 }
 0x68f   : > { %p4132_p3 = pneg %p4131_p10 }
 0x690   : > { %p4138_p12 = por %p4137_p4, %p4136_p6 }
 0x692   : > { %p4139_p11 = pnand %p4138_p12, %p4132_p3 }
 0x694   : > { %4142 = shalt.err (!%p4139_p11)
}
 0x695   : > { %s4291_s13 = smov 128  }
 0x696   : > { %3734 = dma.vmem_to_hbm [thread:$0]  (%p5583_p0), %s5373_s17, 2048, %s5369_s11, %s3204_s19, %s4291_s13, %s4291_s13, %s4283_s4  }
 0x697 PF: > { %p3751_p2 = scmp.ge.s32.totalorder %s4269_s16, 2  ;;  %s3235_s24 = sand.u32 1, %s4241_s27  }
 0x698   : > { %p5584_p1 = scmp.ne.s32.totalorder %s5530_s18, 0  ;;  %s3236_s15 = scalar_lea.sflag [#allocation6], %s3235_s24 }
 0x69a   : > { %p3747_p5 = pnand %p3751_p2, %p5584_p1 }
 0x69c   : > { %4212 = dma.done.wait (!%p3747_p5), %s3236_s15, 2048  }
 0x69d   : > { %4214 = vsyncadd (!%p3747_p5), %s3236_s15, 4294965248  ;;  %s31_s16 = sadd.s32 1, %s4269_s16   ;;  %s5586_s24 = sld [smem:[#allocation15_spill]] }
 0x69e   : > { %p5409_p8 = scmp.ge.s32.totalorder %s31_s16, 6   ;;  %s5587_s6 = sld [smem:[#allocation25_spill]] }
 0x69f   : > { %s5588_s4 = sld [smem:[#allocation16_spill]]  ;;  %s5589_s29 = sld [smem:[#allocation26_spill]] }
 0x6a0   : > { %s5590_s30 = sld [smem:[#allocation19_spill]]  ;;  %s5591_s13 = sld [smem:[#allocation20_spill]] }
 0x6a1   : > { %s5592_s14 = sld [smem:[#allocation21_spill]]  ;;  %s5593_s15 = sld [smem:[#allocation22_spill]] }
 0x6a2   : > { %s5594_s21 = smov %s4221_s22  ;;  %s5595_s22 = smov %s4225_s23 }
 0x6a3   : > { %s5596_s23 = smov %s4648_s1  ;;  %s5597_s25 = smov %s4237_s26 }
 0x6a4   : > { %s5598_s26 = smov %s5587_s6  ;;  %s5599_s27 = smov %s4245_s28 }
 0x6a5   : > { %s5600_s28 = smov %s5588_s4  ;;  %30 = sbr.rel (!%p5409_p8) target bundleno = 26 (0x1a), region = 157 }
 0x6ac   :  { %3241 = vsyncpa [#allocation5], 1 }
 0x6ad   :  { %3243 = vsyncpa [#allocation5 + $0x1], 1 }
 0x6ae   :  { %3244 = vsyncpa [#allocation8], 1 }
 0x6af   :  { %3246 = vsyncpa [#allocation8 + $0x1], 1 }
 0x6b0   :  { %3247 = vsyncpa [#allocation6], 1 }
 0x6b1   :  { %3249 = vsyncpa [#allocation6 + $0x1], 1 }

</bundles_post_ra>
